<compile_context>
chip_gen: v6e
topology: v6e:2x2x1
jax: 0.10.0
libtpu: 0.0.40
codegen_flags: <defaults>
</compile_context>

<pallas_src>
import functools

import jax
import jax.numpy as jnp
import numpy as np
from jax.experimental import pallas as pl
from jax.experimental.pallas import tpu as pltpu

LRELU_SLOPE = 0.2
IN_EPS = 1e-5


# ----------------------------- Pallas kernels ------------------------------
def _lrelu(y):
    return jnp.where(y > 0, y, LRELU_SLOPE * y)


def conv_bias_lrelu_kernel(p_ref, wt_ref, b_ref, o_ref):
    # p_ref: (B, K, M) transposed patches; wt_ref: (Cout, K); b_ref: (Cout, 1)
    # o_ref: (B, Cout, M) -- channel-major, lane-dense output.
    wt = wt_ref[...]
    bias = b_ref[...]
    for b in range(p_ref.shape[0]):
        y = jnp.dot(wt, p_ref[b], preferred_element_type=jnp.float32) + bias
        o_ref[b] = _lrelu(y)


def conv_inorm_lrelu_kernel(p_ref, wt_ref, g_ref, bt_ref, o_ref):
    # Conv (no bias) -> InstanceNorm2d(affine) -> LeakyReLU(0.2), fused.
    wt = wt_ref[...]
    g = g_ref[...]
    bt = bt_ref[...]
    inv_m = 1.0 / p_ref.shape[2]
    for b in range(p_ref.shape[0]):
        y = jnp.dot(wt, p_ref[b], preferred_element_type=jnp.float32)  # (Cout, M)
        # One-pass per-(sample, channel) stats over the lane axis, in f32.
        s1 = jnp.sum(y, axis=-1, keepdims=True)
        s2 = jnp.sum(y * y, axis=-1, keepdims=True)
        mean = s1 * inv_m
        var = s2 * inv_m - mean * mean                 # biased var (PyTorch IN)
        yn = (y - mean) * jax.lax.rsqrt(var + IN_EPS)
        o_ref[b] = _lrelu(yn * g + bt)


def conv_inorm_lrelu_head_kernel(p_ref, wt_ref, g_ref, bt_ref, w4_ref, b4_ref, o_ref):
    # Layer 3 (conv + IN + LReLU) with layer 4 (Conv(64->1, k4 s2 p0) over the
    # entire 4x4 map) fused in as a VPU multiply + full reduction.
    wt = wt_ref[...]
    g = g_ref[...]
    bt = bt_ref[...]
    w4 = w4_ref[...]          # (64, 16), same (c, h*4+w) flattening as the act
    b4 = b4_ref[...]          # (1, 1)
    inv_m = 1.0 / p_ref.shape[2]
    for b in range(p_ref.shape[0]):
        y = jnp.dot(wt, p_ref[b], preferred_element_type=jnp.float32)  # (64, 16)
        s1 = jnp.sum(y, axis=-1, keepdims=True)
        s2 = jnp.sum(y * y, axis=-1, keepdims=True)
        mean = s1 * inv_m
        var = s2 * inv_m - mean * mean
        yn = (y - mean) * jax.lax.rsqrt(var + IN_EPS)
        act = _lrelu(yn * g + bt)
        o_ref[b] = jnp.sum(act * w4, keepdims=True) + b4               # (1, 1)


# ------------------------------- runners ------------------------------------
def _pick_batch_tile(n):
    """Samples per grid step: keep >=2 'parallel' steps (v7x has 2 TensorCores)
    while growing the tile at larger batches to amortize per-step overhead."""
    if n <= 2:
        return 1
    best = 1
    for bt in range(1, min(n // 2, 32) + 1):
        if n % bt == 0:
            best = bt
    return best


def _run_layer(kernel_fn, patches, params2d, out_tail, b_tile):
    """Grid over batch tiles; each step handles `b_tile` samples.

    patches:  (N, K, M) transposed im2col patches (K on sublanes, M on lanes).
    params2d: list of 2-D parameter arrays, passed whole to every grid step.
    out_tail: trailing (rows, cols) of the per-sample output block.
    """
    N, K, M = patches.shape
    in_specs = [pl.BlockSpec((b_tile, K, M), lambda n: (n, 0, 0))]
    in_specs += [pl.BlockSpec(a.shape, lambda n: (0, 0)) for a in params2d]
    return pl.pallas_call(
        kernel_fn,
        out_shape=jax.ShapeDtypeStruct((N,) + out_tail, jnp.float32),
        grid=(N // b_tile,),
        in_specs=in_specs,
        out_specs=pl.BlockSpec((b_tile,) + out_tail, lambda n: (n, 0, 0)),
        compiler_params=pltpu.CompilerParams(dimension_semantics=("parallel",)),
    )(patches, *params2d)


# ------------------------------- JAX glue -----------------------------------
def _patches_t(h, k, s, p):
    """h: (N, C, H, W) -> transposed patches (N, C*k*k, Ho*Wo), Ho, Wo.

    Feature order is channel-major (c, kh, kw), matching w.reshape(Cout, -1)."""
    pt = jax.lax.conv_general_dilated_patches(
        h, filter_shape=(k, k), window_strides=(s, s),
        padding=((p, p), (p, p)),
        dimension_numbers=("NCHW", "OIHW", "NCHW"))
    N, K, Ho, Wo = pt.shape
    return pt.reshape(N, K, Ho * Wo), Ho, Wo


def critic_forward(params, x, labels, *, img_size, compute_dtype=jnp.float32):
    # compute_dtype=jnp.bfloat16: cast the MXU operands (patches + weights)
    # for v6e/v7x's bf16-native MXU; IN stats / affine / head stay in f32.
    N = x.shape[0]
    emb = params["embed"][labels].reshape(N, 1, img_size, img_size)   # nn.Embedding
    h = jnp.concatenate([x, emb], axis=1)                             # (N, 2, 64, 64)
    b_tile = _pick_batch_tile(N)

    def cast(a):
        return a.astype(compute_dtype)

    # layer 0: Conv(+bias) + LeakyReLU
    p, Ho, Wo = _patches_t(h, 4, 2, 1)
    wt0 = params["w0"].reshape(params["w0"].shape[0], -1)
    out = _run_layer(conv_bias_lrelu_kernel, cast(p),
                     [cast(wt0), params["b0"].reshape(-1, 1)],
                     (wt0.shape[0], Ho * Wo), b_tile)
    h = out.reshape(N, -1, Ho, Wo)                                    # already NCHW

    # layers 1-2: Conv(no bias) + InstanceNorm(affine) + LeakyReLU
    for i in (1, 2):
        p, Ho, Wo = _patches_t(h, 4, 2, 1)
        wti = params[f"w{i}"].reshape(params[f"w{i}"].shape[0], -1)
        out = _run_layer(conv_inorm_lrelu_kernel, cast(p),
                         [cast(wti),
                          params[f"g{i}"].reshape(-1, 1),
                          params[f"bt{i}"].reshape(-1, 1)],
                         (wti.shape[0], Ho * Wo), b_tile)
        h = out.reshape(N, -1, Ho, Wo)

    # layer 3 (Conv + IN + LReLU) fused with layer 4 (Conv(+bias), k4 s2 p0).
    p, Ho, Wo = _patches_t(h, 4, 2, 1)                                # (N, 512, 16)
    wt3 = params["w3"].reshape(params["w3"].shape[0], -1)             # (64, 512)
    w4f = params["w4"].reshape(params["w4"].shape[1], -1)             # (64, 16)
    out = _run_layer(conv_inorm_lrelu_head_kernel, cast(p),
                     [cast(wt3),
                      params["g3"].reshape(-1, 1),
                      params["bt3"].reshape(-1, 1),
                      w4f.astype(jnp.float32),
                      params["b4"].reshape(1, 1)],
                     (1, 1), b_tile)
    return out.reshape(N, 1, 1, 1)


# -------------------------- deterministic params ----------------------------
def init_params(key, channels_img, features_d, num_classes, img_size):
    ks = jax.random.split(key, 16)
    fd = features_d

    def conv_w(k, cout, cin):
        return 0.02 * jax.random.normal(k, (cout, cin, 4, 4), jnp.float32)

    return {
        "embed": 0.1 * jax.random.normal(ks[0], (num_classes, img_size * img_size), jnp.float32),
        "w0": conv_w(ks[1], fd, channels_img + 1),
        "b0": 0.01 * jax.random.normal(ks[2], (fd,), jnp.float32),
        "w1": conv_w(ks[3], fd * 2, fd),
        "g1": 1.0 + 0.1 * jax.random.normal(ks[4], (fd * 2,), jnp.float32),
        "bt1": 0.1 * jax.random.normal(ks[5], (fd * 2,), jnp.float32),
        "w2": conv_w(ks[6], fd * 4, fd * 2),
        "g2": 1.0 + 0.1 * jax.random.normal(ks[7], (fd * 4,), jnp.float32),
        "bt2": 0.1 * jax.random.normal(ks[8], (fd * 4,), jnp.float32),
        "w3": conv_w(ks[9], fd * 8, fd * 4),
        "g3": 1.0 + 0.1 * jax.random.normal(ks[10], (fd * 8,), jnp.float32),
        "bt3": 0.1 * jax.random.normal(ks[11], (fd * 8,), jnp.float32),
        "w4": conv_w(ks[12], 1, fd * 8),
        "b4": 0.01 * jax.random.normal(ks[13], (1,), jnp.float32),
    }


# ----------------------- pure-JAX reference (checking) ----------------------
def critic_reference(params, x, labels, *, img_size):
    def conv(h, w, b, stride, pad):
        out = jax.lax.conv_general_dilated(
            h, w, (stride, stride), [(pad, pad), (pad, pad)],
            dimension_numbers=("NCHW", "OIHW", "NCHW"))
        if b is not None:
            out = out + b[None, :, None, None]
        return out

    def lrelu(v):
        return jnp.where(v > 0, v, LRELU_SLOPE * v)

    def inorm(v, g, bt):
        m = v.mean(axis=(2, 3), keepdims=True)
        var = ((v - m) ** 2).mean(axis=(2, 3), keepdims=True)
        return (v - m) / jnp.sqrt(var + IN_EPS) * g[None, :, None, None] + bt[None, :, None, None]

    N = x.shape[0]
    emb = params["embed"][labels].reshape(N, 1, img_size, img_size)
    h = jnp.concatenate([x, emb], axis=1)
    h = lrelu(conv(h, params["w0"], params["b0"], 2, 1))
    for i in (1, 2, 3):
        h = conv(h, params[f"w{i}"], None, 2, 1)
        h = lrelu(inorm(h, params[f"g{i}"], params[f"bt{i}"]))
    return conv(h, params["w4"], params["b4"], 2, 0)


# ----------------------------------- main ------------------------------------
if __name__ == "__main__":
    channels_img, features_d, num_classes, img_size = 1, 8, 4, 64
    batch = 2

    key = jax.random.PRNGKey(0)
    k_params, k_x, k_lbl = jax.random.split(key, 3)

    params = init_params(k_params, channels_img, features_d, num_classes, img_size)
    x = jax.random.normal(k_x, (batch, channels_img, img_size, img_size), jnp.float32)
    labels = jax.random.randint(k_lbl, (batch,), 0, num_classes, jnp.int32)

    fwd = jax.jit(functools.partial(critic_forward, img_size=img_size))
    out = fwd(params, x, labels)
    out = jax.block_until_ready(out)

    ref = jax.block_until_ready(critic_reference(params, x, labels, img_size=img_size))

    assert out.shape == (batch, 1, 1, 1), out.shape
    np.testing.assert_allclose(np.asarray(out), np.asarray(ref), rtol=5e-3, atol=5e-3)

    print("KERNEL_OK")
</pallas_src>

<mosaic_0001>
module attributes {stable_mosaic.version = 11 : i64} {
  func.func @conv_bias_lrelu_kernel(%arg0: i32, %arg1: memref<1x32x1024xf32, #tpu.memory_space<vmem>>, %arg2: memref<8x32xf32, #tpu.memory_space<vmem>>, %arg3: memref<8x1xf32, #tpu.memory_space<vmem>>, %arg4: memref<1x8x1024xf32, #tpu.memory_space<vmem>>) attributes {dimension_semantics = [#tpu.dimension_semantics<parallel>], iteration_bounds = array<i64: 2>, scalar_prefetch = 0 : i64, scratch_operands = 0 : i64, tpu.core_type = #tpu.core_type<tc>, window_params = [{transform_indices = @transform_0, window_bounds = array<i64: 1, 32, 1024>}, {pipeline_mode = #tpu.pipeline_mode<synchronous>, transform_indices = @transform_1, window_bounds = array<i64: 8, 32>}, {pipeline_mode = #tpu.pipeline_mode<synchronous>, transform_indices = @transform_2, window_bounds = array<i64: 8, 1>}, {transform_indices = @transform_3, window_bounds = array<i64: 1, 8, 1024>}]} {
    %c0 = arith.constant 0 : index
    %c0_0 = arith.constant 0 : index
    %0 = vector.load %arg2[%c0, %c0_0] : memref<8x32xf32, #tpu.memory_space<vmem>>, vector<8x32xf32>
    %c0_1 = arith.constant 0 : index
    %c0_2 = arith.constant 0 : index
    %1 = vector.load %arg3[%c0_1, %c0_2] : memref<8x1xf32, #tpu.memory_space<vmem>>, vector<8x1xf32>
    %c0_3 = arith.constant 0 : index
    %c0_4 = arith.constant 0 : index
    %c0_5 = arith.constant 0 : index
    %2 = vector.load %arg1[%c0_3, %c0_4, %c0_5] : memref<1x32x1024xf32, #tpu.memory_space<vmem>>, vector<1x32x1024xf32>
    %3 = vector.shape_cast %2 : vector<1x32x1024xf32> to vector<32x1024xf32>
    %cst = arith.constant dense<0.000000e+00> : vector<8x1024xf32>
    %4 = tpu.matmul %0, %3, %cst {dimension_numbers = #tpu.dot_dimension_numbers<[1], [0], [0], [1], [0, 0, 1, 1], [], []>} : vector<8x32xf32>, vector<32x1024xf32>, vector<8x1024xf32> -> vector<8x1024xf32>
    %5 = vector.broadcast %1 : vector<8x1xf32> to vector<8x1024xf32>
    %6 = arith.addf %4, %5 : vector<8x1024xf32>
    %cst_6 = arith.constant 0.000000e+00 : f32
    %7 = vector.broadcast %cst_6 : f32 to vector<8x1024xf32>
    %8 = arith.cmpf ogt, %6, %7 : vector<8x1024xf32>
    %cst_7 = arith.constant 2.000000e-01 : f32
    %9 = vector.broadcast %cst_7 : f32 to vector<8x1024xf32>
    %10 = arith.mulf %9, %6 : vector<8x1024xf32>
    %11 = arith.select %8, %6, %10 : vector<8x1024xi1>, vector<8x1024xf32>
    %c0_8 = arith.constant 0 : index
    %c0_9 = arith.constant 0 : index
    %c0_10 = arith.constant 0 : index
    %12 = vector.load %arg4[%c0_8, %c0_9, %c0_10] : memref<1x8x1024xf32, #tpu.memory_space<vmem>>, vector<1x8x1024xf32>
    %13 = vector.shape_cast %12 : vector<1x8x1024xf32> to vector<8x1024xf32>
    %14 = vector.shape_cast %11 : vector<8x1024xf32> to vector<1x8x1024xf32>
    tpu.vector_store %arg4[%c0_8, %c0_9, %c0_10], %14 {strides = array<i32>} : memref<1x8x1024xf32, #tpu.memory_space<vmem>>, vector<1x8x1024xf32>,
    return
  }
  func.func @transform_0(%arg0: i32) -> (i32, i32, i32) {
    %c0_i32 = arith.constant 0 : i32
    %c0_i32_0 = arith.constant 0 : i32
    %c0_i32_1 = arith.constant 0 : i32
    return %arg0, %c0_i32, %c0_i32_0 : i32, i32, i32
  }
  func.func @transform_1(%arg0: i32) -> (i32, i32) {
    %c0_i32 = arith.constant 0 : i32
    %c0_i32_0 = arith.constant 0 : i32
    %c0_i32_1 = arith.constant 0 : i32
    return %c0_i32, %c0_i32_0 : i32, i32
  }
  func.func @transform_2(%arg0: i32) -> (i32, i32) {
    %c0_i32 = arith.constant 0 : i32
    %c0_i32_0 = arith.constant 0 : i32
    %c0_i32_1 = arith.constant 0 : i32
    return %c0_i32, %c0_i32_0 : i32, i32
  }
  func.func @transform_3(%arg0: i32) -> (i32, i32, i32) {
    %c0_i32 = arith.constant 0 : i32
    %c0_i32_0 = arith.constant 0 : i32
    %c0_i32_1 = arith.constant 0 : i32
    return %arg0, %c0_i32, %c0_i32_0 : i32, i32, i32
  }
}

module attributes {stable_mosaic.version = 11 : i64} {
  func.func @conv_inorm_lrelu_kernel(%arg0: i32, %arg1: memref<1x128x256xf32, #tpu.memory_space<vmem>>, %arg2: memref<16x128xf32, #tpu.memory_space<vmem>>, %arg3: memref<16x1xf32, #tpu.memory_space<vmem>>, %arg4: memref<16x1xf32, #tpu.memory_space<vmem>>, %arg5: memref<1x16x256xf32, #tpu.memory_space<vmem>>) attributes {dimension_semantics = [#tpu.dimension_semantics<parallel>], iteration_bounds = array<i64: 2>, scalar_prefetch = 0 : i64, scratch_operands = 0 : i64, tpu.core_type = #tpu.core_type<tc>, window_params = [{transform_indices = @transform_0, window_bounds = array<i64: 1, 128, 256>}, {pipeline_mode = #tpu.pipeline_mode<synchronous>, transform_indices = @transform_1, window_bounds = array<i64: 16, 128>}, {pipeline_mode = #tpu.pipeline_mode<synchronous>, transform_indices = @transform_2, window_bounds = array<i64: 16, 1>}, {pipeline_mode = #tpu.pipeline_mode<synchronous>, transform_indices = @transform_3, window_bounds = array<i64: 16, 1>}, {transform_indices = @transform_4, window_bounds = array<i64: 1, 16, 256>}]} {
    %c0 = arith.constant 0 : index
    %c0_0 = arith.constant 0 : index
    %0 = vector.load %arg2[%c0, %c0_0] : memref<16x128xf32, #tpu.memory_space<vmem>>, vector<16x128xf32>
    %c0_1 = arith.constant 0 : index
    %c0_2 = arith.constant 0 : index
    %1 = vector.load %arg3[%c0_1, %c0_2] : memref<16x1xf32, #tpu.memory_space<vmem>>, vector<16x1xf32>
    %c0_3 = arith.constant 0 : index
    %c0_4 = arith.constant 0 : index
    %2 = vector.load %arg4[%c0_3, %c0_4] : memref<16x1xf32, #tpu.memory_space<vmem>>, vector<16x1xf32>
    %c0_5 = arith.constant 0 : index
    %c0_6 = arith.constant 0 : index
    %c0_7 = arith.constant 0 : index
    %3 = vector.load %arg1[%c0_5, %c0_6, %c0_7] : memref<1x128x256xf32, #tpu.memory_space<vmem>>, vector<1x128x256xf32>
    %4 = vector.shape_cast %3 : vector<1x128x256xf32> to vector<128x256xf32>
    %cst = arith.constant dense<0.000000e+00> : vector<16x256xf32>
    %5 = tpu.matmul %0, %4, %cst {dimension_numbers = #tpu.dot_dimension_numbers<[1], [0], [0], [1], [0, 0, 1, 1], [], []>} : vector<16x128xf32>, vector<128x256xf32>, vector<16x256xf32> -> vector<16x256xf32>
    %cst_8 = arith.constant dense<0.000000e+00> : vector<16xf32>
    %6 = vector.multi_reduction <add>, %5, %cst_8 [1] : vector<16x256xf32> to vector<16xf32>
    %7 = vector.shape_cast %6 : vector<16xf32> to vector<16x1xf32>
    %8 = arith.mulf %5, %5 : vector<16x256xf32>
    %cst_9 = arith.constant dense<0.000000e+00> : vector<16xf32>
    %9 = vector.multi_reduction <add>, %8, %cst_9 [1] : vector<16x256xf32> to vector<16xf32>
    %10 = vector.shape_cast %9 : vector<16xf32> to vector<16x1xf32>
    %cst_10 = arith.constant 3.906250e-03 : f32
    %11 = vector.broadcast %cst_10 : f32 to vector<16x1xf32>
    %12 = arith.mulf %7, %11 : vector<16x1xf32>
    %cst_11 = arith.constant 3.906250e-03 : f32
    %13 = vector.broadcast %cst_11 : f32 to vector<16x1xf32>
    %14 = arith.mulf %10, %13 : vector<16x1xf32>
    %15 = arith.mulf %12, %12 : vector<16x1xf32>
    %16 = arith.subf %14, %15 : vector<16x1xf32>
    %17 = vector.broadcast %12 : vector<16x1xf32> to vector<16x256xf32>
    %18 = arith.subf %5, %17 : vector<16x256xf32>
    %cst_12 = arith.constant 9.99999974E-6 : f32
    %19 = vector.broadcast %cst_12 : f32 to vector<16x1xf32>
    %20 = arith.addf %16, %19 : vector<16x1xf32>
    %21 = math.rsqrt %20 : vector<16x1xf32>
    %22 = vector.broadcast %21 : vector<16x1xf32> to vector<16x256xf32>
    %23 = arith.mulf %18, %22 : vector<16x256xf32>
    %24 = vector.broadcast %1 : vector<16x1xf32> to vector<16x256xf32>
    %25 = arith.mulf %23, %24 : vector<16x256xf32>
    %26 = vector.broadcast %2 : vector<16x1xf32> to vector<16x256xf32>
    %27 = arith.addf %25, %26 : vector<16x256xf32>
    %cst_13 = arith.constant 0.000000e+00 : f32
    %28 = vector.broadcast %cst_13 : f32 to vector<16x256xf32>
    %29 = arith.cmpf ogt, %27, %28 : vector<16x256xf32>
    %cst_14 = arith.constant 2.000000e-01 : f32
    %30 = vector.broadcast %cst_14 : f32 to vector<16x256xf32>
    %31 = arith.mulf %30, %27 : vector<16x256xf32>
    %32 = arith.select %29, %27, %31 : vector<16x256xi1>, vector<16x256xf32>
    %c0_15 = arith.constant 0 : index
    %c0_16 = arith.constant 0 : index
    %c0_17 = arith.constant 0 : index
    %33 = vector.load %arg5[%c0_15, %c0_16, %c0_17] : memref<1x16x256xf32, #tpu.memory_space<vmem>>, vector<1x16x256xf32>
    %34 = vector.shape_cast %33 : vector<1x16x256xf32> to vector<16x256xf32>
    %35 = vector.shape_cast %32 : vector<16x256xf32> to vector<1x16x256xf32>
    tpu.vector_store %arg5[%c0_15, %c0_16, %c0_17], %35 {strides = array<i32>} : memref<1x16x256xf32, #tpu.memory_space<vmem>>, vector<1x16x256xf32>,
    return
  }
  func.func @transform_0(%arg0: i32) -> (i32, i32, i32) {
    %c0_i32 = arith.constant 0 : i32
    %c0_i32_0 = arith.constant 0 : i32
    %c0_i32_1 = arith.constant 0 : i32
    return %arg0, %c0_i32, %c0_i32_0 : i32, i32, i32
  }
  func.func @transform_1(%arg0: i32) -> (i32, i32) {
    %c0_i32 = arith.constant 0 : i32
    %c0_i32_0 = arith.constant 0 : i32
    %c0_i32_1 = arith.constant 0 : i32
    return %c0_i32, %c0_i32_0 : i32, i32
  }
  func.func @transform_2(%arg0: i32) -> (i32, i32) {
    %c0_i32 = arith.constant 0 : i32
    %c0_i32_0 = arith.constant 0 : i32
    %c0_i32_1 = arith.constant 0 : i32
    return %c0_i32, %c0_i32_0 : i32, i32
  }
  func.func @transform_3(%arg0: i32) -> (i32, i32) {
    %c0_i32 = arith.constant 0 : i32
    %c0_i32_0 = arith.constant 0 : i32
    %c0_i32_1 = arith.constant 0 : i32
    return %c0_i32, %c0_i32_0 : i32, i32
  }
  func.func @transform_4(%arg0: i32) -> (i32, i32, i32) {
    %c0_i32 = arith.constant 0 : i32
    %c0_i32_0 = arith.constant 0 : i32
    %c0_i32_1 = arith.constant 0 : i32
    return %arg0, %c0_i32, %c0_i32_0 : i32, i32, i32
  }
}

module attributes {stable_mosaic.version = 11 : i64} {
  func.func @conv_inorm_lrelu_kernel(%arg0: i32, %arg1: memref<1x256x64xf32, #tpu.memory_space<vmem>>, %arg2: memref<32x256xf32, #tpu.memory_space<vmem>>, %arg3: memref<32x1xf32, #tpu.memory_space<vmem>>, %arg4: memref<32x1xf32, #tpu.memory_space<vmem>>, %arg5: memref<1x32x64xf32, #tpu.memory_space<vmem>>) attributes {dimension_semantics = [#tpu.dimension_semantics<parallel>], iteration_bounds = array<i64: 2>, scalar_prefetch = 0 : i64, scratch_operands = 0 : i64, tpu.core_type = #tpu.core_type<tc>, window_params = [{transform_indices = @transform_0, window_bounds = array<i64: 1, 256, 64>}, {pipeline_mode = #tpu.pipeline_mode<synchronous>, transform_indices = @transform_1, window_bounds = array<i64: 32, 256>}, {pipeline_mode = #tpu.pipeline_mode<synchronous>, transform_indices = @transform_2, window_bounds = array<i64: 32, 1>}, {pipeline_mode = #tpu.pipeline_mode<synchronous>, transform_indices = @transform_3, window_bounds = array<i64: 32, 1>}, {transform_indices = @transform_4, window_bounds = array<i64: 1, 32, 64>}]} {
    %c0 = arith.constant 0 : index
    %c0_0 = arith.constant 0 : index
    %0 = vector.load %arg2[%c0, %c0_0] : memref<32x256xf32, #tpu.memory_space<vmem>>, vector<32x256xf32>
    %c0_1 = arith.constant 0 : index
    %c0_2 = arith.constant 0 : index
    %1 = vector.load %arg3[%c0_1, %c0_2] : memref<32x1xf32, #tpu.memory_space<vmem>>, vector<32x1xf32>
    %c0_3 = arith.constant 0 : index
    %c0_4 = arith.constant 0 : index
    %2 = vector.load %arg4[%c0_3, %c0_4] : memref<32x1xf32, #tpu.memory_space<vmem>>, vector<32x1xf32>
    %c0_5 = arith.constant 0 : index
    %c0_6 = arith.constant 0 : index
    %c0_7 = arith.constant 0 : index
    %3 = vector.load %arg1[%c0_5, %c0_6, %c0_7] : memref<1x256x64xf32, #tpu.memory_space<vmem>>, vector<1x256x64xf32>
    %4 = vector.shape_cast %3 : vector<1x256x64xf32> to vector<256x64xf32>
    %cst = arith.constant dense<0.000000e+00> : vector<32x64xf32>
    %5 = tpu.matmul %0, %4, %cst {dimension_numbers = #tpu.dot_dimension_numbers<[1], [0], [0], [1], [0, 0, 1, 1], [], []>} : vector<32x256xf32>, vector<256x64xf32>, vector<32x64xf32> -> vector<32x64xf32>
    %cst_8 = arith.constant dense<0.000000e+00> : vector<32xf32>
    %6 = vector.multi_reduction <add>, %5, %cst_8 [1] : vector<32x64xf32> to vector<32xf32>
    %7 = vector.shape_cast %6 : vector<32xf32> to vector<32x1xf32>
    %8 = arith.mulf %5, %5 : vector<32x64xf32>
    %cst_9 = arith.constant dense<0.000000e+00> : vector<32xf32>
    %9 = vector.multi_reduction <add>, %8, %cst_9 [1] : vector<32x64xf32> to vector<32xf32>
    %10 = vector.shape_cast %9 : vector<32xf32> to vector<32x1xf32>
    %cst_10 = arith.constant 1.562500e-02 : f32
    %11 = vector.broadcast %cst_10 : f32 to vector<32x1xf32>
    %12 = arith.mulf %7, %11 : vector<32x1xf32>
    %cst_11 = arith.constant 1.562500e-02 : f32
    %13 = vector.broadcast %cst_11 : f32 to vector<32x1xf32>
    %14 = arith.mulf %10, %13 : vector<32x1xf32>
    %15 = arith.mulf %12, %12 : vector<32x1xf32>
    %16 = arith.subf %14, %15 : vector<32x1xf32>
    %17 = vector.broadcast %12 : vector<32x1xf32> to vector<32x64xf32>
    %18 = arith.subf %5, %17 : vector<32x64xf32>
    %cst_12 = arith.constant 9.99999974E-6 : f32
    %19 = vector.broadcast %cst_12 : f32 to vector<32x1xf32>
    %20 = arith.addf %16, %19 : vector<32x1xf32>
    %21 = math.rsqrt %20 : vector<32x1xf32>
    %22 = vector.broadcast %21 : vector<32x1xf32> to vector<32x64xf32>
    %23 = arith.mulf %18, %22 : vector<32x64xf32>
    %24 = vector.broadcast %1 : vector<32x1xf32> to vector<32x64xf32>
    %25 = arith.mulf %23, %24 : vector<32x64xf32>
    %26 = vector.broadcast %2 : vector<32x1xf32> to vector<32x64xf32>
    %27 = arith.addf %25, %26 : vector<32x64xf32>
    %cst_13 = arith.constant 0.000000e+00 : f32
    %28 = vector.broadcast %cst_13 : f32 to vector<32x64xf32>
    %29 = arith.cmpf ogt, %27, %28 : vector<32x64xf32>
    %cst_14 = arith.constant 2.000000e-01 : f32
    %30 = vector.broadcast %cst_14 : f32 to vector<32x64xf32>
    %31 = arith.mulf %30, %27 : vector<32x64xf32>
    %32 = arith.select %29, %27, %31 : vector<32x64xi1>, vector<32x64xf32>
    %c0_15 = arith.constant 0 : index
    %c0_16 = arith.constant 0 : index
    %c0_17 = arith.constant 0 : index
    %33 = vector.load %arg5[%c0_15, %c0_16, %c0_17] : memref<1x32x64xf32, #tpu.memory_space<vmem>>, vector<1x32x64xf32>
    %34 = vector.shape_cast %33 : vector<1x32x64xf32> to vector<32x64xf32>
    %35 = vector.shape_cast %32 : vector<32x64xf32> to vector<1x32x64xf32>
    tpu.vector_store %arg5[%c0_15, %c0_16, %c0_17], %35 {strides = array<i32>} : memref<1x32x64xf32, #tpu.memory_space<vmem>>, vector<1x32x64xf32>,
    return
  }
  func.func @transform_0(%arg0: i32) -> (i32, i32, i32) {
    %c0_i32 = arith.constant 0 : i32
    %c0_i32_0 = arith.constant 0 : i32
    %c0_i32_1 = arith.constant 0 : i32
    return %arg0, %c0_i32, %c0_i32_0 : i32, i32, i32
  }
  func.func @transform_1(%arg0: i32) -> (i32, i32) {
    %c0_i32 = arith.constant 0 : i32
    %c0_i32_0 = arith.constant 0 : i32
    %c0_i32_1 = arith.constant 0 : i32
    return %c0_i32, %c0_i32_0 : i32, i32
  }
  func.func @transform_2(%arg0: i32) -> (i32, i32) {
    %c0_i32 = arith.constant 0 : i32
    %c0_i32_0 = arith.constant 0 : i32
    %c0_i32_1 = arith.constant 0 : i32
    return %c0_i32, %c0_i32_0 : i32, i32
  }
  func.func @transform_3(%arg0: i32) -> (i32, i32) {
    %c0_i32 = arith.constant 0 : i32
    %c0_i32_0 = arith.constant 0 : i32
    %c0_i32_1 = arith.constant 0 : i32
    return %c0_i32, %c0_i32_0 : i32, i32
  }
  func.func @transform_4(%arg0: i32) -> (i32, i32, i32) {
    %c0_i32 = arith.constant 0 : i32
    %c0_i32_0 = arith.constant 0 : i32
    %c0_i32_1 = arith.constant 0 : i32
    return %arg0, %c0_i32, %c0_i32_0 : i32, i32, i32
  }
}

module attributes {stable_mosaic.version = 11 : i64} {
  func.func @conv_inorm_lrelu_head_kernel(%arg0: i32, %arg1: memref<1x512x16xf32, #tpu.memory_space<vmem>>, %arg2: memref<64x512xf32, #tpu.memory_space<vmem>>, %arg3: memref<64x1xf32, #tpu.memory_space<vmem>>, %arg4: memref<64x1xf32, #tpu.memory_space<vmem>>, %arg5: memref<64x16xf32, #tpu.memory_space<vmem>>, %arg6: memref<1x1xf32, #tpu.memory_space<vmem>>, %arg7: memref<1x1x1xf32, #tpu.memory_space<vmem>>) attributes {dimension_semantics = [#tpu.dimension_semantics<parallel>], iteration_bounds = array<i64: 2>, scalar_prefetch = 0 : i64, scratch_operands = 0 : i64, tpu.core_type = #tpu.core_type<tc>, window_params = [{transform_indices = @transform_0, window_bounds = array<i64: 1, 512, 16>}, {pipeline_mode = #tpu.pipeline_mode<synchronous>, transform_indices = @transform_1, window_bounds = array<i64: 64, 512>}, {pipeline_mode = #tpu.pipeline_mode<synchronous>, transform_indices = @transform_2, window_bounds = array<i64: 64, 1>}, {pipeline_mode = #tpu.pipeline_mode<synchronous>, transform_indices = @transform_3, window_bounds = array<i64: 64, 1>}, {pipeline_mode = #tpu.pipeline_mode<synchronous>, transform_indices = @transform_4, window_bounds = array<i64: 64, 16>}, {pipeline_mode = #tpu.pipeline_mode<synchronous>, transform_indices = @transform_5, window_bounds = array<i64: 1, 1>}, {transform_indices = @transform_6, window_bounds = array<i64: 1, 1, 1>}]} {
    %c0 = arith.constant 0 : index
    %c0_0 = arith.constant 0 : index
    %0 = vector.load %arg2[%c0, %c0_0] : memref<64x512xf32, #tpu.memory_space<vmem>>, vector<64x512xf32>
    %c0_1 = arith.constant 0 : index
    %c0_2 = arith.constant 0 : index
    %1 = vector.load %arg3[%c0_1, %c0_2] : memref<64x1xf32, #tpu.memory_space<vmem>>, vector<64x1xf32>
    %c0_3 = arith.constant 0 : index
    %c0_4 = arith.constant 0 : index
    %2 = vector.load %arg4[%c0_3, %c0_4] : memref<64x1xf32, #tpu.memory_space<vmem>>, vector<64x1xf32>
    %c0_5 = arith.constant 0 : index
    %c0_6 = arith.constant 0 : index
    %3 = vector.load %arg5[%c0_5, %c0_6] : memref<64x16xf32, #tpu.memory_space<vmem>>, vector<64x16xf32>
    %c0_7 = arith.constant 0 : index
    %c0_8 = arith.constant 0 : index
    %4 = vector.load %arg6[%c0_7, %c0_8] : memref<1x1xf32, #tpu.memory_space<vmem>>, vector<1x1xf32>
    %c0_9 = arith.constant 0 : index
    %c0_10 = arith.constant 0 : index
    %c0_11 = arith.constant 0 : index
    %5 = vector.load %arg1[%c0_9, %c0_10, %c0_11] : memref<1x512x16xf32, #tpu.memory_space<vmem>>, vector<1x512x16xf32>
    %6 = vector.shape_cast %5 : vector<1x512x16xf32> to vector<512x16xf32>
    %cst = arith.constant dense<0.000000e+00> : vector<64x16xf32>
    %7 = tpu.matmul %0, %6, %cst {dimension_numbers = #tpu.dot_dimension_numbers<[1], [0], [0], [1], [0, 0, 1, 1], [], []>} : vector<64x512xf32>, vector<512x16xf32>, vector<64x16xf32> -> vector<64x16xf32>
    %cst_12 = arith.constant dense<0.000000e+00> : vector<64xf32>
    %8 = vector.multi_reduction <add>, %7, %cst_12 [1] : vector<64x16xf32> to vector<64xf32>
    %9 = vector.shape_cast %8 : vector<64xf32> to vector<64x1xf32>
    %10 = arith.mulf %7, %7 : vector<64x16xf32>
    %cst_13 = arith.constant dense<0.000000e+00> : vector<64xf32>
    %11 = vector.multi_reduction <add>, %10, %cst_13 [1] : vector<64x16xf32> to vector<64xf32>
    %12 = vector.shape_cast %11 : vector<64xf32> to vector<64x1xf32>
    %cst_14 = arith.constant 6.250000e-02 : f32
    %13 = vector.broadcast %cst_14 : f32 to vector<64x1xf32>
    %14 = arith.mulf %9, %13 : vector<64x1xf32>
    %cst_15 = arith.constant 6.250000e-02 : f32
    %15 = vector.broadcast %cst_15 : f32 to vector<64x1xf32>
    %16 = arith.mulf %12, %15 : vector<64x1xf32>
    %17 = arith.mulf %14, %14 : vector<64x1xf32>
    %18 = arith.subf %16, %17 : vector<64x1xf32>
    %19 = vector.broadcast %14 : vector<64x1xf32> to vector<64x16xf32>
    %20 = arith.subf %7, %19 : vector<64x16xf32>
    %cst_16 = arith.constant 9.99999974E-6 : f32
    %21 = vector.broadcast %cst_16 : f32 to vector<64x1xf32>
    %22 = arith.addf %18, %21 : vector<64x1xf32>
    %23 = math.rsqrt %22 : vector<64x1xf32>
    %24 = vector.broadcast %23 : vector<64x1xf32> to vector<64x16xf32>
    %25 = arith.mulf %20, %24 : vector<64x16xf32>
    %26 = vector.broadcast %1 : vector<64x1xf32> to vector<64x16xf32>
    %27 = arith.mulf %25, %26 : vector<64x16xf32>
    %28 = vector.broadcast %2 : vector<64x1xf32> to vector<64x16xf32>
    %29 = arith.addf %27, %28 : vector<64x16xf32>
    %cst_17 = arith.constant 0.000000e+00 : f32
    %30 = vector.broadcast %cst_17 : f32 to vector<64x16xf32>
    %31 = arith.cmpf ogt, %29, %30 : vector<64x16xf32>
    %cst_18 = arith.constant 2.000000e-01 : f32
    %32 = vector.broadcast %cst_18 : f32 to vector<64x16xf32>
    %33 = arith.mulf %32, %29 : vector<64x16xf32>
    %34 = arith.select %31, %29, %33 : vector<64x16xi1>, vector<64x16xf32>
    %35 = arith.mulf %34, %3 : vector<64x16xf32>
    %36 = vector.shape_cast %35 : vector<64x16xf32> to vector<1x64x16xf32>
    %cst_19 = arith.constant dense<0.000000e+00> : vector<1xf32>
    %37 = vector.multi_reduction <add>, %36, %cst_19 [1, 2] : vector<1x64x16xf32> to vector<1xf32>
    %38 = vector.shape_cast %37 : vector<1xf32> to vector<1x1x1xf32>
    %39 = vector.extract %38[0, 0, 0] : f32 from vector<1x1x1xf32>
    %40 = vector.broadcast %39 : f32 to vector<1x1xf32>
    %41 = arith.addf %40, %4 : vector<1x1xf32>
    %c0_20 = arith.constant 0 : index
    %c0_21 = arith.constant 0 : index
    %c0_22 = arith.constant 0 : index
    %42 = vector.load %arg7[%c0_20, %c0_21, %c0_22] : memref<1x1x1xf32, #tpu.memory_space<vmem>>, vector<1x1x1xf32>
    %43 = vector.shape_cast %42 : vector<1x1x1xf32> to vector<1x1xf32>
    %44 = vector.shape_cast %41 : vector<1x1xf32> to vector<1x1x1xf32>
    tpu.vector_store %arg7[%c0_20, %c0_21, %c0_22], %44 {strides = array<i32>} : memref<1x1x1xf32, #tpu.memory_space<vmem>>, vector<1x1x1xf32>,
    return
  }
  func.func @transform_0(%arg0: i32) -> (i32, i32, i32) {
    %c0_i32 = arith.constant 0 : i32
    %c0_i32_0 = arith.constant 0 : i32
    %c0_i32_1 = arith.constant 0 : i32
    return %arg0, %c0_i32, %c0_i32_0 : i32, i32, i32
  }
  func.func @transform_1(%arg0: i32) -> (i32, i32) {
    %c0_i32 = arith.constant 0 : i32
    %c0_i32_0 = arith.constant 0 : i32
    %c0_i32_1 = arith.constant 0 : i32
    return %c0_i32, %c0_i32_0 : i32, i32
  }
  func.func @transform_2(%arg0: i32) -> (i32, i32) {
    %c0_i32 = arith.constant 0 : i32
    %c0_i32_0 = arith.constant 0 : i32
    %c0_i32_1 = arith.constant 0 : i32
    return %c0_i32, %c0_i32_0 : i32, i32
  }
  func.func @transform_3(%arg0: i32) -> (i32, i32) {
    %c0_i32 = arith.constant 0 : i32
    %c0_i32_0 = arith.constant 0 : i32
    %c0_i32_1 = arith.constant 0 : i32
    return %c0_i32, %c0_i32_0 : i32, i32
  }
  func.func @transform_4(%arg0: i32) -> (i32, i32) {
    %c0_i32 = arith.constant 0 : i32
    %c0_i32_0 = arith.constant 0 : i32
    %c0_i32_1 = arith.constant 0 : i32
    return %c0_i32, %c0_i32_0 : i32, i32
  }
  func.func @transform_5(%arg0: i32) -> (i32, i32) {
    %c0_i32 = arith.constant 0 : i32
    %c0_i32_0 = arith.constant 0 : i32
    %c0_i32_1 = arith.constant 0 : i32
    return %c0_i32, %c0_i32_0 : i32, i32
  }
  func.func @transform_6(%arg0: i32) -> (i32, i32, i32) {
    %c0_i32 = arith.constant 0 : i32
    %c0_i32_0 = arith.constant 0 : i32
    %c0_i32_1 = arith.constant 0 : i32
    return %arg0, %c0_i32, %c0_i32_0 : i32, i32, i32
  }
}

</mosaic_0001>

<bundles_post_ra>
// kernel: critic_forward.4
= control target key start
LH: loop header
LB: loop body
LE: loop exit
PB: predicated region body
PF: predicated region fallthrough
CT: control target
= control target key end

     0   :  { %s643_s12 = smov 0   ;;  %s722_s0 = inlined_call_operand.vmem [shape: f32[2,32,1024], index: 0, kind: input, shape index: {}]   ;;  %s723_s1 = inlined_call_operand.vmem [shape: f32[8,32], index: 1, kind: input, shape index: {}]   ;;  %s724_s2 = inlined_call_operand.vmem [shape: f32[8,1], index: 2, kind: input, shape index: {}]   ;;  %s725_s3 = inlined_call_operand.vmem [shape: f32[2,8,1024], index: 3, kind: output, shape index: {}]  }
   0x1 LB: > { %s585_s13 = sadd.s32 4294967295, %s619_s12   ;;  %p589_p0 = scmp.ge.s32.totalorder %s619_s12, 1  ;;  %s619_s12 = sphi %s643_s12, %s13_s12  }
   0x2   : > { %p137_p1 = scmp.lt.s32.totalorder %s619_s12, 3 }
   0x4   : > { %p138_p2 = pnand %p589_p0, %p137_p1 }
   0x5   : > { %p161_p3 = scmp.lt.s32.totalorder (!%p138_p2), %s585_s13, 1 }
   0x6   : > { %141 = sbr.rel (%p138_p2) target bundleno = 236 (0xec), region = 32 }
   0xb   : > { %v172_v0 = vld [vmem:[%s724_s2] sm:$0xff]  ;;  %v621_v1 = vmov 0.0   ;;  %s727_s13 = smov (!%p161_p3, %s585_s13), 1  ;;  %v622_v2 = vmov 0   ;;  %vm210_vm0 = vcmask 261120  }
   0xc   : > { %278 = vmatprep.mubr.f32.mxu0 %v621_v1  ;;  %349 = vmatprep.mubr.f32.mxu1 %v621_v1  ;;  %s600_s16 = sshll.u32 %s727_s13, 8  ;;  %v171_v19 = vld [vmem:[%s723_s1] sm:$0xff]  ;;  %s601_s22 = sshll.u32 %s727_s13, 6 }
   0xd   : > { %612 = vset.pattern.permute.xlu0 %v622_v2  ;;  %s662_s19 = scalar_lea.vmem %s722_s0, %s600_s16  ;;  %s709_s25 = scalar_lea.vmem %s725_s3, %s601_s22 }
   0xe   : > { %207 = vperm.xlu0 %612, %v172_v0   ;;  %v198_v3 = vld [vmem:[%s662_s19 + $0xc8] sm:$0xff]  ;;  %v200_v4 = vld [vmem:[%s662_s19 + $0xd8] sm:$0xff]  ;;  %v197_v5 = vld [vmem:[%s662_s19 + $0xc0] sm:$0xff] }
   0xf   : > { %238 = vmatprep.subr.mxu0 %v198_v3  ;;  %309 = vmatprep.subr.mxu1 %v200_v4  ;;  %v199_v6 = vld [vmem:[%s662_s19 + $0xd0] sm:$0xff]  ;;  %v190_v7 = vld [vmem:[%s662_s19 + $0x88] sm:$0xff]  ;;  %v192_v8 = vld [vmem:[%s662_s19 + $0x98] sm:$0xff] }
  0x10   : > { %239 = vmatpush1.msra.mxu0 %v197_v5  ;;  %310 = vmatpush1.msra.mxu1 %v199_v6  ;;  %v189_v9 = vld [vmem:[%s662_s19 + $0x80] sm:$0xff]  ;;  %v191_v10 = vld [vmem:[%s662_s19 + $0x90] sm:$0xff]  ;;  %v182_v11 = vld [vmem:[%s662_s19 + $0x48] sm:$0xff] }
  0x11   : > { %240 = vmatprep.subr.mxu0 %v190_v7  ;;  %311 = vmatprep.subr.mxu1 %v192_v8  ;;  %v184_v12 = vld [vmem:[%s662_s19 + $0x58] sm:$0xff]  ;;  %v181_v13 = vld [vmem:[%s662_s19 + $0x40] sm:$0xff]  ;;  %v183_v14 = vld [vmem:[%s662_s19 + $0x50] sm:$0xff] }
  0x12   : > { %241 = vmatpush1.msra.mxu0 %v189_v9  ;;  %312 = vmatpush1.msra.mxu1 %v191_v10  ;;  %v174_v15 = vld [vmem:[%s662_s19 + $0x8] sm:$0xff]  ;;  %v176_v16 = vld [vmem:[%s662_s19 + $0x18] sm:$0xff]  ;;  %v173_v17 = vld [vmem:[%s662_s19] sm:$0xff] }
  0x13   : > { %242 = vmatprep.subr.mxu0 %v182_v11  ;;  %313 = vmatprep.subr.mxu1 %v184_v12  ;;  %v175_v18 = vld [vmem:[%s662_s19 + $0x10] sm:$0xff]  ;;  %v202_v20 = vld [vmem:[%s662_s19 + $0xe8] sm:$0xff]  ;;  %v204_v21 = vld [vmem:[%s662_s19 + $0xf8] sm:$0xff] }
  0x14   : > { %243 = vmatpush1.msra.mxu0 %v181_v13  ;;  %314 = vmatpush1.msra.mxu1 %v183_v14  ;;  %v201_v22 = vld [vmem:[%s662_s19 + $0xe0] sm:$0xff]  ;;  %v203_v23 = vld [vmem:[%s662_s19 + $0xf0] sm:$0xff]  ;;  %v194_v24 = vld [vmem:[%s662_s19 + $0xa8] sm:$0xff] }
  0x15   : > { %244 = vmatprep.subr.mxu0 %v174_v15  ;;  %315 = vmatprep.subr.mxu1 %v176_v16  ;;  %v196_v25 = vld [vmem:[%s662_s19 + $0xb8] sm:$0xff]  ;;  %v193_v26 = vld [vmem:[%s662_s19 + $0xa0] sm:$0xff]  ;;  %v195_v27 = vld [vmem:[%s662_s19 + $0xb0] sm:$0xff] }
  0x16   : > { %245 = vmatpush1.msra.mxu0 %v173_v17  ;;  %316 = vmatpush1.msra.mxu1 %v175_v18  ;;  %v186_v28 = vld [vmem:[%s662_s19 + $0x68] sm:$0xff]  ;;  %v188_v29 = vld [vmem:[%s662_s19 + $0x78] sm:$0xff]  ;;  %v185_v30 = vld [vmem:[%s662_s19 + $0x60] sm:$0xff] }
  0x17   : > { %594 = vmatmul.mubr.msk.f32.vlgmr.msra.gmra.mxu0 %vm210_vm0, %v171_v19  ;;  %595 = vmatmul.mubr.msk.f32.vlgmr.msra.gmra.mxu1 %vm210_vm0, %v171_v19  ;;  %v187_v31 = vld [vmem:[%s662_s19 + $0x70] sm:$0xff]  ;;  %v178_v32 = vld [vmem:[%s662_s19 + $0x28] sm:$0xff]  ;;  %v180_v33 = vld [vmem:[%s662_s19 + $0x38] sm:$0xff] }
  0x18   : > { %380 = vmatprep.subr.mxu0 %v202_v20  ;;  %451 = vmatprep.subr.mxu1 %v204_v21  ;;  %v177_v34 = vld [vmem:[%s662_s19 + $0x20] sm:$0xff]  ;;  %v179_v35 = vld [vmem:[%s662_s19 + $0x30] sm:$0xff] }
  0x19   : > { %381 = vmatpush1.msra.mxu0 %v201_v22  ;;  %452 = vmatpush1.msra.mxu1 %v203_v23 }
  0x1a   : > { %382 = vmatprep.subr.mxu0 %v194_v24  ;;  %453 = vmatprep.subr.mxu1 %v196_v25 }
  0x1b   : > { %383 = vmatpush1.msra.mxu0 %v193_v26  ;;  %454 = vmatpush1.msra.mxu1 %v195_v27 }
  0x1c   : > { %384 = vmatprep.subr.mxu0 %v186_v28  ;;  %455 = vmatprep.subr.mxu1 %v188_v29 }
  0x1d   : > { %385 = vmatpush1.msra.mxu0 %v185_v30  ;;  %456 = vmatpush1.msra.mxu1 %v187_v31 }
  0x1e   : > { %386 = vmatprep.subr.mxu0 %v178_v32  ;;  %457 = vmatprep.subr.mxu1 %v180_v33 }
  0x1f   : > { %387 = vmatpush1.msra.mxu0 %v177_v34  ;;  %420 = vmatprep.mubr.f32.mxu0 %v621_v1 }
  0x20   : > { %458 = vmatpush1.msra.mxu1 %v179_v35  ;;  %491 = vmatprep.mubr.f32.mxu1 %v621_v1 }
  0x21   : > { %596 = vmatmul.mubr.msk.f32.vlgmr.msra.gmra.mxu0 %vm210_vm0, %v171_v19  ;;  %597 = vmatmul.mubr.msk.f32.vlgmr.msra.gmra.mxu1 %vm210_vm0, %v171_v19 }
  0x89   : > { %v208_v36 = vpop.permute.xlu0 %207 }
  0xd7   : > { %v280_v37 = vpop.f32.mrf.mxu0  ;;  %v351_v38 = vpop.f32.mrf.mxu1 }
  0xd8   : > { %v281_v39 = vadd.f32 %v280_v37, %v208_v36  ;;  %v352_v40 = vadd.f32 %v351_v38, %v208_v36 }
  0xd9   : > { %v282_v41 = vpop.f32.mrf.mxu0  ;;  %v353_v42 = vpop.f32.mrf.mxu1 }
  0xda   : > { %vm498_vm1 = vcmp.gt.f32.partialorder %v281_v39, 0.0  ;;  %v506_v43 = vmul.f32 0.2, %v281_v39  ;;  %vm500_vm2 = vcmp.gt.f32.partialorder %v352_v40, 0.0  ;;  %v508_v44 = vmul.f32 0.2, %v352_v40 }
  0xdb   : > { %v283_v45 = vadd.f32 %v282_v41, %v208_v36  ;;  %v354_v46 = vadd.f32 %v353_v42, %v208_v36 }
  0xdc   : > { %v514_v47 = vsel %vm498_vm1, %v281_v39, %v506_v43  ;;  %v516_v48 = vsel %vm500_vm2, %v352_v40, %v508_v44 }
  0xdd   : > { %522 = vst [vmem:[%s709_s25] sm:$0xff] %v514_v47  ;;  %524 = vst [vmem:[%s709_s25 + $0x10] sm:$0xff] %v516_v48  ;;  %vm499_vm3 = vcmp.gt.f32.partialorder %v283_v45, 0.0  ;;  %v507_v49 = vmul.f32 0.2, %v283_v45  ;;  %vm501_vm4 = vcmp.gt.f32.partialorder %v354_v46, 0.0 }
  0xde   : > { %v509_v50 = vmul.f32 0.2, %v354_v46 }
  0xdf   : > { %v515_v51 = vsel %vm499_vm3, %v283_v45, %v507_v49 }
  0xe0   : > { %v517_v52 = vsel %vm501_vm4, %v354_v46, %v509_v50  ;;  %523 = vst [vmem:[%s709_s25 + $0x8] sm:$0xff] %v515_v51 }
  0xe1   : > { %525 = vst [vmem:[%s709_s25 + $0x18] sm:$0xff] %v517_v52  ;;  %v422_v53 = vpop.f32.mrf.mxu0  ;;  %v493_v54 = vpop.f32.mrf.mxu1 }
  0xe2   : > { %v423_v55 = vadd.f32 %v422_v53, %v208_v36  ;;  %v494_v56 = vadd.f32 %v493_v54, %v208_v36 }
  0xe3   : > { %v424_v57 = vpop.f32.mrf.mxu0  ;;  %v495_v58 = vpop.f32.mrf.mxu1 }
  0xe4   : > { %vm502_vm5 = vcmp.gt.f32.partialorder %v423_v55, 0.0  ;;  %v510_v59 = vmul.f32 0.2, %v423_v55  ;;  %vm504_vm6 = vcmp.gt.f32.partialorder %v494_v56, 0.0  ;;  %v512_v60 = vmul.f32 0.2, %v494_v56 }
  0xe5   : > { %v425_v61 = vadd.f32 %v424_v57, %v208_v36  ;;  %v496_v62 = vadd.f32 %v495_v58, %v208_v36 }
  0xe6   : > { %v518_v63 = vsel %vm502_vm5, %v423_v55, %v510_v59  ;;  %v520_v0 = vsel %vm504_vm6, %v494_v56, %v512_v60 }
  0xe7   : > { %526 = vst [vmem:[%s709_s25 + $0x20] sm:$0xff] %v518_v63  ;;  %528 = vst [vmem:[%s709_s25 + $0x30] sm:$0xff] %v520_v0  ;;  %vm503_vm7 = vcmp.gt.f32.partialorder %v425_v61, 0.0  ;;  %v511_v1 = vmul.f32 0.2, %v425_v61  ;;  %vm505_vm8 = vcmp.gt.f32.partialorder %v496_v62, 0.0 }
  0xe8   : > { %v513_v2 = vmul.f32 0.2, %v496_v62 }
  0xe9   : > { %v519_v3 = vsel %vm503_vm7, %v425_v61, %v511_v1 }
  0xea   : > { %v521_v4 = vsel %vm505_vm8, %v496_v62, %v513_v2  ;;  %527 = vst [vmem:[%s709_s25 + $0x28] sm:$0xff] %v519_v3 }
  0xeb   : > { %529 = vst [vmem:[%s709_s25 + $0x38] sm:$0xff] %v521_v4 }
  0xec PF: > { %s13_s12 = sadd.s32 1, %s619_s12  }
  0xed   : > { %p10_p4 = scmp.ge.s32.totalorder %s13_s12, 4  }
  0xef   :  { %12 = sbr.rel (!%p10_p4) target bundleno = 1 (0x1), region = 62 }

// kernel: critic_forward.5
= control target key start
LH: loop header
LB: loop body
LE: loop exit
PB: predicated region body
PF: predicated region fallthrough
CT: control target
= control target key end

     0   :  { %s544_s15 = smov 0   ;;  %s617_s0 = inlined_call_operand.vmem [shape: f32[2,128,256], index: 0, kind: input, shape index: {}]   ;;  %s618_s1 = inlined_call_operand.vmem [shape: f32[16,128], index: 1, kind: input, shape index: {}]   ;;  %s619_s2 = inlined_call_operand.vmem [shape: f32[16,1], index: 2, kind: input, shape index: {}]   ;;  %s620_s3 = inlined_call_operand.vmem [shape: f32[16,1], index: 3, kind: input, shape index: {}]   ;;  %s621_s4 = inlined_call_operand.vmem [shape: f32[2,16,256], index: 4, kind: output, shape index: {}]  }
   0x1 LB: > { %s448_s16 = sadd.s32 4294967295, %s515_s15   ;;  %p452_p0 = scmp.ge.s32.totalorder %s515_s15, 1  ;;  %s515_s15 = sphi %s544_s15, %s14_s15  }
   0x2   : > { %p162_p1 = scmp.lt.s32.totalorder %s515_s15, 3 }
   0x4   : > { %p163_p2 = pnand %p452_p0, %p162_p1 }
   0x5   : > { %p188_p3 = scmp.lt.s32.totalorder (!%p163_p2), %s448_s16, 1 }
   0x6   : > { %166 = sbr.rel (%p163_p2) target bundleno = 419 (0x1a3), region = 36 }
   0xb   : > { %v201_v0 = vld [vmem:[%s619_s2 + $0x8] sm:$0xff]  ;;  %v517_v1 = vmov 0.0   ;;  %s623_s16 = smov (!%p188_p3, %s448_s16), 1  ;;  %v518_v2 = vmov 0   ;;  %v198_v35 = vld [vmem:[%s618_s1] sm:$0xff] }
   0xc   : > { %300 = vmatprep.mubr.f32.mxu0 %v517_v1  ;;  %306 = vmatprep.mubr.f32.mxu1 %v517_v1  ;;  %s459_s19 = sshll.u32 %s623_s16, 8  ;;  %v199_v36 = vld [vmem:[%s618_s1 + $0x8] sm:$0xff]  ;;  %v202_v37 = vld [vmem:[%s620_s3] sm:$0xff]  ;;  %s460_s7 = sshll.u32 %s623_s16, 5 }
   0xd   : > { %504 = vset.pattern.permute.xlu1 %v518_v2  ;;  %503 = vset.pattern.permute.xlu0 %v518_v2  ;;  %s561_s22 = scalar_lea.vmem %s617_s0, %s459_s19  ;;  %v203_v50 = vld [vmem:[%s620_s3 + $0x8] sm:$0xff]  ;;  %v200_v51 = vld [vmem:[%s619_s2] sm:$0xff]  ;;  %s197_s10 = scalar_lea.vmem %s621_s4, %s460_s7 }
   0xe   : > { %356 = vperm.xlu1 %504, %v201_v0   ;;  %v235_v3 = vld [vmem:[%s561_s22 + $0xf8] sm:$0xff]  ;;  %v234_v4 = vld [vmem:[%s561_s22 + $0xf0] sm:$0xff]  ;;  %v233_v5 = vld [vmem:[%s561_s22 + $0xe8] sm:$0xff] }
   0xf   : > { %236 = vmatprep.subr.mxu0 %v235_v3  ;;  %461 = vmatprep.subr.mxu1 %v235_v3  ;;  %v232_v6 = vld [vmem:[%s561_s22 + $0xe0] sm:$0xff]  ;;  %v231_v7 = vld [vmem:[%s561_s22 + $0xd8] sm:$0xff]  ;;  %v230_v8 = vld [vmem:[%s561_s22 + $0xd0] sm:$0xff] }
  0x10   : > { %237 = vmatpush1.msra.mxu0 %v234_v4  ;;  %477 = vmatpush1.msra.mxu1 %v234_v4  ;;  %v229_v9 = vld [vmem:[%s561_s22 + $0xc8] sm:$0xff]  ;;  %v228_v10 = vld [vmem:[%s561_s22 + $0xc0] sm:$0xff]  ;;  %v227_v11 = vld [vmem:[%s561_s22 + $0xb8] sm:$0xff] }
  0x11   : > { %238 = vmatprep.subr.mxu0 %v233_v5  ;;  %462 = vmatprep.subr.mxu1 %v233_v5  ;;  %v226_v12 = vld [vmem:[%s561_s22 + $0xb0] sm:$0xff]  ;;  %v225_v13 = vld [vmem:[%s561_s22 + $0xa8] sm:$0xff]  ;;  %v224_v14 = vld [vmem:[%s561_s22 + $0xa0] sm:$0xff] }
  0x12   : > { %239 = vmatpush1.msra.mxu0 %v232_v6  ;;  %478 = vmatpush1.msra.mxu1 %v232_v6  ;;  %v223_v15 = vld [vmem:[%s561_s22 + $0x98] sm:$0xff]  ;;  %v222_v16 = vld [vmem:[%s561_s22 + $0x90] sm:$0xff]  ;;  %v221_v17 = vld [vmem:[%s561_s22 + $0x88] sm:$0xff] }
  0x13   : > { %240 = vmatprep.subr.mxu0 %v231_v7  ;;  %463 = vmatprep.subr.mxu1 %v231_v7  ;;  %v220_v18 = vld [vmem:[%s561_s22 + $0x80] sm:$0xff]  ;;  %v219_v19 = vld [vmem:[%s561_s22 + $0x78] sm:$0xff]  ;;  %v218_v20 = vld [vmem:[%s561_s22 + $0x70] sm:$0xff] }
  0x14   : > { %241 = vmatpush1.msra.mxu0 %v230_v8  ;;  %479 = vmatpush1.msra.mxu1 %v230_v8  ;;  %v217_v21 = vld [vmem:[%s561_s22 + $0x68] sm:$0xff]  ;;  %v216_v22 = vld [vmem:[%s561_s22 + $0x60] sm:$0xff]  ;;  %v215_v23 = vld [vmem:[%s561_s22 + $0x58] sm:$0xff] }
  0x15   : > { %242 = vmatprep.subr.mxu0 %v229_v9  ;;  %464 = vmatprep.subr.mxu1 %v229_v9  ;;  %v214_v24 = vld [vmem:[%s561_s22 + $0x50] sm:$0xff]  ;;  %v213_v25 = vld [vmem:[%s561_s22 + $0x48] sm:$0xff]  ;;  %v212_v26 = vld [vmem:[%s561_s22 + $0x40] sm:$0xff] }
  0x16   : > { %243 = vmatpush1.msra.mxu0 %v228_v10  ;;  %480 = vmatpush1.msra.mxu1 %v228_v10  ;;  %v211_v27 = vld [vmem:[%s561_s22 + $0x38] sm:$0xff]  ;;  %v210_v28 = vld [vmem:[%s561_s22 + $0x30] sm:$0xff]  ;;  %v209_v29 = vld [vmem:[%s561_s22 + $0x28] sm:$0xff] }
  0x17   : > { %244 = vmatprep.subr.mxu0 %v227_v11  ;;  %465 = vmatprep.subr.mxu1 %v227_v11  ;;  %v208_v30 = vld [vmem:[%s561_s22 + $0x20] sm:$0xff]  ;;  %v207_v31 = vld [vmem:[%s561_s22 + $0x18] sm:$0xff]  ;;  %v206_v32 = vld [vmem:[%s561_s22 + $0x10] sm:$0xff] }
  0x18   : > { %245 = vmatpush1.msra.mxu0 %v226_v12  ;;  %481 = vmatpush1.msra.mxu1 %v226_v12  ;;  %v205_v33 = vld [vmem:[%s561_s22 + $0x8] sm:$0xff]  ;;  %v204_v34 = vld [vmem:[%s561_s22] sm:$0xff] }
  0x19   : > { %246 = vmatprep.subr.mxu0 %v225_v13  ;;  %466 = vmatprep.subr.mxu1 %v225_v13 }
  0x1a   : > { %247 = vmatpush1.msra.mxu0 %v224_v14  ;;  %482 = vmatpush1.msra.mxu1 %v224_v14 }
  0x1b   : > { %248 = vmatprep.subr.mxu0 %v223_v15  ;;  %467 = vmatprep.subr.mxu1 %v223_v15 }
  0x1c   : > { %249 = vmatpush1.msra.mxu0 %v222_v16  ;;  %483 = vmatpush1.msra.mxu1 %v222_v16 }
  0x1d   : > { %250 = vmatprep.subr.mxu0 %v221_v17  ;;  %468 = vmatprep.subr.mxu1 %v221_v17 }
  0x1e   : > { %251 = vmatpush1.msra.mxu0 %v220_v18  ;;  %484 = vmatpush1.msra.mxu1 %v220_v18 }
  0x1f   : > { %252 = vmatprep.subr.mxu0 %v219_v19  ;;  %469 = vmatprep.subr.mxu1 %v219_v19 }
  0x20   : > { %253 = vmatpush1.msra.mxu0 %v218_v20  ;;  %485 = vmatpush1.msra.mxu1 %v218_v20 }
  0x21   : > { %254 = vmatprep.subr.mxu0 %v217_v21  ;;  %470 = vmatprep.subr.mxu1 %v217_v21 }
  0x22   : > { %255 = vmatpush1.msra.mxu0 %v216_v22  ;;  %486 = vmatpush1.msra.mxu1 %v216_v22 }
  0x23   : > { %256 = vmatprep.subr.mxu0 %v215_v23  ;;  %471 = vmatprep.subr.mxu1 %v215_v23 }
  0x24   : > { %257 = vmatpush1.msra.mxu0 %v214_v24  ;;  %487 = vmatpush1.msra.mxu1 %v214_v24 }
  0x25   : > { %258 = vmatprep.subr.mxu0 %v213_v25  ;;  %472 = vmatprep.subr.mxu1 %v213_v25 }
  0x26   : > { %259 = vmatpush1.msra.mxu0 %v212_v26  ;;  %488 = vmatpush1.msra.mxu1 %v212_v26 }
  0x27   : > { %260 = vmatprep.subr.mxu0 %v211_v27  ;;  %473 = vmatprep.subr.mxu1 %v211_v27 }
  0x28   : > { %261 = vmatpush1.msra.mxu0 %v210_v28  ;;  %489 = vmatpush1.msra.mxu1 %v210_v28 }
  0x29   : > { %262 = vmatprep.subr.mxu0 %v209_v29  ;;  %474 = vmatprep.subr.mxu1 %v209_v29 }
  0x2a   : > { %263 = vmatpush1.msra.mxu0 %v208_v30  ;;  %490 = vmatpush1.msra.mxu1 %v208_v30 }
  0x2b   : > { %264 = vmatprep.subr.mxu0 %v207_v31  ;;  %475 = vmatprep.subr.mxu1 %v207_v31 }
  0x2c   : > { %265 = vmatpush1.msra.mxu0 %v206_v32  ;;  %491 = vmatpush1.msra.mxu1 %v206_v32 }
  0x2d   : > { %266 = vmatprep.subr.mxu0 %v205_v33  ;;  %476 = vmatprep.subr.mxu1 %v205_v33 }
  0x2e   : > { %267 = vmatpush1.msra.mxu0 %v204_v34  ;;  %492 = vmatpush1.msra.mxu1 %v204_v34 }
  0x2f   : > { %301 = vmatmul.mubr.f32.vlgmr.msra.gmra.mxu0 %v198_v35  ;;  %307 = vmatmul.mubr.f32.vlgmr.msra.gmra.mxu1 %v199_v36 }
  0x30   : > { %365 = vperm.xlu1 %504, %v202_v37  }
  0x89   : > { %v357_v52 = vpop.permute.xlu1 %356 }
  0xab   : > { %v366_v53 = vpop.permute.xlu1 %365 }
  0xef   : > { %v302_v38 = vpop.f32.mrf.mxu0  ;;  %v308_v39 = vpop.f32.mrf.mxu1 }
  0xf0   : > { %v319_v44 = vmul.f32 %v302_v38, %v302_v38  ;;  %v321_v47 = vmul.f32 %v308_v39, %v308_v39 }
  0xf1   : > { %v304_v40 = vpop.f32.mrf.mxu0  ;;  %v310_v41 = vpop.f32.mrf.mxu1 }
  0xf2   : > { %v320_v42 = vmul.f32 %v304_v40, %v304_v40  ;;  %v313_v43 = vadd.f32 %v304_v40, %v302_v38  ;;  %v322_v45 = vmul.f32 %v310_v41, %v310_v41  ;;  %v316_v48 = vadd.f32 %v310_v41, %v308_v39 }
  0xf4   : > { %314 = vadd.xlane.f32.xlu0 %v313_v43  ;;  %v323_v46 = vadd.f32 %v320_v42, %v319_v44  ;;  %v326_v49 = vadd.f32 %v322_v45, %v321_v47 }
  0xf6   : > { %324 = vadd.xlane.f32.xlu1 %v323_v46 }
  0xf8   : > { %317 = vadd.xlane.f32.xlu0 %v316_v48 }
  0xfa   : > { %327 = vadd.xlane.f32.xlu1 %v326_v49 }
 0x10b   : > { %370 = vperm.xlu1 %504, %v203_v50  }
 0x10e   : > { %351 = vperm.xlu0 %503, %v200_v51  }
 0x17d   : > { %v315_v54 = vpop.xlane.xlu0 %314 }
 0x17e   : > { %v329_v55 = vmul.f32 0.00390625, %v315_v54 }
 0x17f   : > { %v325_v56 = vpop.xlane.xlu1 %324 }
 0x180   : > { %v331_v57 = vmul.f32 0.00390625, %v325_v56  ;;  %v333_v58 = vmul.f32 %v329_v55, %v329_v55  ;;  %v337_v4 = vsub.f32 %v302_v38, %v329_v55  ;;  %v338_v5 = vsub.f32 %v304_v40, %v329_v55 }
 0x181   : > { %v318_v59 = vpop.xlane.xlu0 %317 }
 0x182   : > { %v335_v60 = vsub.f32 %v331_v57, %v333_v58  ;;  %v330_v61 = vmul.f32 0.00390625, %v318_v59 }
 0x183   : > { %v328_v62 = vpop.xlane.xlu1 %327 }
 0x184   : > { %v341_v63 = vadd.f32 1e-05, %v335_v60  ;;  %v332_v0 = vmul.f32 0.00390625, %v328_v62  ;;  %v334_v1 = vmul.f32 %v330_v61, %v330_v61  ;;  %v339_v12 = vsub.f32 %v308_v39, %v330_v61 }
 0x185   : > { %v340_v13 = vsub.f32 %v310_v41, %v330_v61 }
 0x186   : > { %505 = vrsqrt.f32 %v341_v63  ;;  %v336_v2 = vsub.f32 %v332_v0, %v334_v1 }
 0x187   : > { %v371_v23 = vpop.permute.xlu1 %370 }
 0x188   : > { %v342_v3 = vadd.f32 1e-05, %v336_v2 }
 0x189   : > { %v352_v7 = vpop.permute.xlu0 %351 }
 0x18a   : > { %507 = vrsqrt.f32 %v342_v3 }
 0x193   : > { %v506_v6 = vpop.eup %505 }
 0x194   : > { %v345_v8 = vmul.f32 %v506_v6, %v337_v4  ;;  %v346_v9 = vmul.f32 %v506_v6, %v338_v5 }
 0x196   : > { %v359_v10 = vmul.f32 %v352_v7, %v345_v8  ;;  %v360_v11 = vmul.f32 %v352_v7, %v346_v9 }
 0x197   : > { %v508_v14 = vpop.eup %507 }
 0x198   : > { %v373_v15 = vadd.f32 %v366_v53, %v359_v10  ;;  %v374_v16 = vadd.f32 %v366_v53, %v360_v11  ;;  %v347_v17 = vmul.f32 %v508_v14, %v339_v12  ;;  %v348_v18 = vmul.f32 %v508_v14, %v340_v13 }
 0x19a   : > { %vm377_vm0 = vcmp.gt.f32.partialorder %v373_v15, 0.0  ;;  %vm378_vm1 = vcmp.gt.f32.partialorder %v374_v16, 0.0  ;;  %v381_v19 = vmul.f32 0.2, %v373_v15  ;;  %v382_v20 = vmul.f32 0.2, %v374_v16 }
 0x19b   : > { %v361_v21 = vmul.f32 %v357_v52, %v347_v17  ;;  %v362_v22 = vmul.f32 %v357_v52, %v348_v18 }
 0x19c   : > { %v385_v24 = vsel %vm377_vm0, %v373_v15, %v381_v19  ;;  %v386_v25 = vsel %vm378_vm1, %v374_v16, %v382_v20 }
 0x19d   : > { %v375_v26 = vadd.f32 %v371_v23, %v361_v21  ;;  %v376_v27 = vadd.f32 %v371_v23, %v362_v22  ;;  %389 = vst [vmem:[%s197_s10] sm:$0xff] %v385_v24  ;;  %390 = vst [vmem:[%s197_s10 + $0x8] sm:$0xff] %v386_v25 }
 0x19f   : > { %vm379_vm2 = vcmp.gt.f32.partialorder %v375_v26, 0.0  ;;  %vm380_vm3 = vcmp.gt.f32.partialorder %v376_v27, 0.0  ;;  %v383_v28 = vmul.f32 0.2, %v375_v26  ;;  %v384_v29 = vmul.f32 0.2, %v376_v27 }
 0x1a1   : > { %v387_v30 = vsel %vm379_vm2, %v375_v26, %v383_v28  ;;  %v388_v31 = vsel %vm380_vm3, %v376_v27, %v384_v29 }
 0x1a2   : > { %391 = vst [vmem:[%s197_s10 + $0x10] sm:$0xff] %v387_v30  ;;  %392 = vst [vmem:[%s197_s10 + $0x18] sm:$0xff] %v388_v31 }
 0x1a3 PF: > { %s14_s15 = sadd.s32 1, %s515_s15  }
 0x1a4   : > { %p11_p4 = scmp.ge.s32.totalorder %s14_s15, 4  }
 0x1a6   :  { %13 = sbr.rel (!%p11_p4) target bundleno = 1 (0x1), region = 66 }

// kernel: critic_forward.6
= control target key start
LH: loop header
LB: loop body
LE: loop exit
PB: predicated region body
PF: predicated region fallthrough
CT: control target
= control target key end

     0   :  { %s653_s15 = smov 0   ;;  %s798_s0 = inlined_call_operand.vmem [shape: f32[2,256,64], index: 0, kind: input, shape index: {}]   ;;  %s799_s1 = inlined_call_operand.vmem [shape: f32[32,256], index: 1, kind: input, shape index: {}]   ;;  %s800_s2 = inlined_call_operand.vmem [shape: f32[32,1], index: 2, kind: input, shape index: {}]   ;;  %s801_s3 = inlined_call_operand.vmem [shape: f32[32,1], index: 3, kind: input, shape index: {}]   ;;  %s802_s4 = inlined_call_operand.vmem [shape: f32[2,32,64], index: 4, kind: output, shape index: {}]  }
   0x1 LB: > { %s511_s16 = sadd.s32 4294967295, %s625_s15   ;;  %p515_p0 = scmp.ge.s32.totalorder %s625_s15, 1  ;;  %s625_s15 = sphi %s653_s15, %s14_s15  }
   0x2   : > { %p162_p1 = scmp.lt.s32.totalorder %s625_s15, 3 }
   0x4   : > { %p163_p2 = pnand %p515_p0, %p162_p1 }
   0x5   : > { %p188_p3 = scmp.lt.s32.totalorder (!%p163_p2), %s511_s16, 1 }
   0x6   : > { %166 = sbr.rel (%p163_p2) target bundleno = 494 (0x1ee), region = 36 }
   0xb   : > { %v199_v0 = vld [vmem:[%s799_s1 + $0x8] sm:$0xff]  ;;  %s804_s16 = smov (!%p188_p3, %s511_s16), 1  ;;  %v198_v34 = vld [vmem:[%s799_s1] sm:$0xff]  ;;  %v201_v36 = vld [vmem:[%s799_s1 + $0x18] sm:$0xff]  ;;  %v627_v40 = vmov 0   ;;  %vm331_vm0 = vcmask 523264  }
   0xc   : > { %v203_v1 = vld [vmem:[%s799_s1 + $0x28] sm:$0xff]  ;;  %310 = vmatprep.mubr.f32.mxu0 %v199_v0  ;;  %s522_s21 = sshll.u32 %s804_s16, 8  ;;  %v202_v35 = vld [vmem:[%s799_s1 + $0x20] sm:$0xff]  ;;  %v205_v37 = vld [vmem:[%s799_s1 + $0x38] sm:$0xff]  ;;  %610 = vset.pattern.permute.xlu1 %v627_v40  ;;  %s523_s29 = sshll.u32 %s804_s16, 5 }
   0xd   : > { %320 = vmatprep.mubr.f32.mxu1 %v203_v1  ;;  %s673_s24 = scalar_lea.vmem %s798_s0, %s522_s21  ;;  %v200_v38 = vld [vmem:[%s799_s1 + $0x10] sm:$0xff]  ;;  %609 = vset.pattern.permute.xlu0 %v627_v40  ;;  %v207_v57 = vld [vmem:[%s800_s2 + $0x8] sm:$0xff]  ;;  %v209_v59 = vld [vmem:[%s800_s2 + $0x18] sm:$0xff]  ;;  %s783_s6 = scalar_lea.vmem %s802_s4, %s523_s29 }
   0xe   : > { %v245_v2 = vld [vmem:[%s673_s24 + $0xf8] sm:$0xff]  ;;  %v244_v4 = vld [vmem:[%s673_s24 + $0xf0] sm:$0xff]  ;;  %v243_v6 = vld [vmem:[%s673_s24 + $0xe8] sm:$0xff] }
   0xf   : > { %v229_v3 = vld [vmem:[%s673_s24 + $0x78] sm:$0xff]  ;;  %524 = vmatprep.subr.mxu0 %v245_v2  ;;  %568 = vmatprep.subr.mxu1 %v245_v2  ;;  %v228_v5 = vld [vmem:[%s673_s24 + $0x70] sm:$0xff]  ;;  %v227_v7 = vld [vmem:[%s673_s24 + $0x68] sm:$0xff] }
  0x10   : > { %525 = vmatpush3.msra.mxu0 %v229_v3  ;;  %584 = vmatpush3.msra.mxu1 %v229_v3  ;;  %v242_v8 = vld [vmem:[%s673_s24 + $0xe0] sm:$0xff]  ;;  %v241_v10 = vld [vmem:[%s673_s24 + $0xd8] sm:$0xff]  ;;  %v240_v12 = vld [vmem:[%s673_s24 + $0xd0] sm:$0xff] }
  0x11   : > { %526 = vmatprep.subr.mxu0 %v244_v4  ;;  %569 = vmatprep.subr.mxu1 %v244_v4  ;;  %v226_v9 = vld [vmem:[%s673_s24 + $0x60] sm:$0xff]  ;;  %v225_v11 = vld [vmem:[%s673_s24 + $0x58] sm:$0xff]  ;;  %v224_v13 = vld [vmem:[%s673_s24 + $0x50] sm:$0xff] }
  0x12   : > { %527 = vmatpush3.msra.mxu0 %v228_v5  ;;  %585 = vmatpush3.msra.mxu1 %v228_v5  ;;  %v239_v14 = vld [vmem:[%s673_s24 + $0xc8] sm:$0xff]  ;;  %v238_v16 = vld [vmem:[%s673_s24 + $0xc0] sm:$0xff]  ;;  %v237_v18 = vld [vmem:[%s673_s24 + $0xb8] sm:$0xff] }
  0x13   : > { %528 = vmatprep.subr.mxu0 %v243_v6  ;;  %570 = vmatprep.subr.mxu1 %v243_v6  ;;  %v223_v15 = vld [vmem:[%s673_s24 + $0x48] sm:$0xff]  ;;  %v222_v17 = vld [vmem:[%s673_s24 + $0x40] sm:$0xff]  ;;  %v221_v19 = vld [vmem:[%s673_s24 + $0x38] sm:$0xff] }
  0x14   : > { %529 = vmatpush3.msra.mxu0 %v227_v7  ;;  %586 = vmatpush3.msra.mxu1 %v227_v7  ;;  %v236_v20 = vld [vmem:[%s673_s24 + $0xb0] sm:$0xff]  ;;  %v235_v22 = vld [vmem:[%s673_s24 + $0xa8] sm:$0xff]  ;;  %v234_v24 = vld [vmem:[%s673_s24 + $0xa0] sm:$0xff] }
  0x15   : > { %530 = vmatprep.subr.mxu0 %v242_v8  ;;  %571 = vmatprep.subr.mxu1 %v242_v8  ;;  %v220_v21 = vld [vmem:[%s673_s24 + $0x30] sm:$0xff]  ;;  %v219_v23 = vld [vmem:[%s673_s24 + $0x28] sm:$0xff]  ;;  %v218_v25 = vld [vmem:[%s673_s24 + $0x20] sm:$0xff] }
  0x16   : > { %531 = vmatpush3.msra.mxu0 %v226_v9  ;;  %587 = vmatpush3.msra.mxu1 %v226_v9  ;;  %v233_v26 = vld [vmem:[%s673_s24 + $0x98] sm:$0xff]  ;;  %v232_v28 = vld [vmem:[%s673_s24 + $0x90] sm:$0xff]  ;;  %v231_v30 = vld [vmem:[%s673_s24 + $0x88] sm:$0xff] }
  0x17   : > { %532 = vmatprep.subr.mxu0 %v241_v10  ;;  %572 = vmatprep.subr.mxu1 %v241_v10  ;;  %v217_v27 = vld [vmem:[%s673_s24 + $0x18] sm:$0xff]  ;;  %v216_v29 = vld [vmem:[%s673_s24 + $0x10] sm:$0xff]  ;;  %v215_v31 = vld [vmem:[%s673_s24 + $0x8] sm:$0xff] }
  0x18   : > { %533 = vmatpush3.msra.mxu0 %v225_v11  ;;  %588 = vmatpush3.msra.mxu1 %v225_v11  ;;  %v230_v32 = vld [vmem:[%s673_s24 + $0x80] sm:$0xff]  ;;  %v204_v39 = vld [vmem:[%s799_s1 + $0x30] sm:$0xff]  ;;  %v211_v61 = vld [vmem:[%s801_s3 + $0x8] sm:$0xff] }
  0x19   : > { %534 = vmatprep.subr.mxu0 %v240_v12  ;;  %573 = vmatprep.subr.mxu1 %v240_v12  ;;  %v214_v33 = vld [vmem:[%s673_s24] sm:$0xff]  ;;  %v208_v58 = vld [vmem:[%s800_s2 + $0x10] sm:$0xff]  ;;  %v213_v8 = vld [vmem:[%s801_s3 + $0x18] sm:$0xff] }
  0x1a   : > { %535 = vmatpush3.msra.mxu0 %v224_v13  ;;  %589 = vmatpush3.msra.mxu1 %v224_v13  ;;  %v210_v60 = vld [vmem:[%s801_s3] sm:$0xff]  ;;  %v212_v63 = vld [vmem:[%s801_s3 + $0x10] sm:$0xff] }
  0x1b   : > { %536 = vmatprep.subr.mxu0 %v239_v14  ;;  %574 = vmatprep.subr.mxu1 %v239_v14  ;;  %v206_v62 = vld [vmem:[%s800_s2] sm:$0xff] }
  0x1c   : > { %537 = vmatpush3.msra.mxu0 %v223_v15  ;;  %590 = vmatpush3.msra.mxu1 %v223_v15 }
  0x1d   : > { %538 = vmatprep.subr.mxu0 %v238_v16  ;;  %575 = vmatprep.subr.mxu1 %v238_v16 }
  0x1e   : > { %539 = vmatpush3.msra.mxu0 %v222_v17  ;;  %591 = vmatpush3.msra.mxu1 %v222_v17 }
  0x1f   : > { %540 = vmatprep.subr.mxu0 %v237_v18  ;;  %576 = vmatprep.subr.mxu1 %v237_v18 }
  0x20   : > { %541 = vmatpush3.msra.mxu0 %v221_v19  ;;  %592 = vmatpush3.msra.mxu1 %v221_v19 }
  0x21   : > { %542 = vmatprep.subr.mxu0 %v236_v20  ;;  %577 = vmatprep.subr.mxu1 %v236_v20 }
  0x22   : > { %543 = vmatpush3.msra.mxu0 %v220_v21  ;;  %593 = vmatpush3.msra.mxu1 %v220_v21 }
  0x23   : > { %544 = vmatprep.subr.mxu0 %v235_v22  ;;  %578 = vmatprep.subr.mxu1 %v235_v22 }
  0x24   : > { %545 = vmatpush3.msra.mxu0 %v219_v23  ;;  %594 = vmatpush3.msra.mxu1 %v219_v23 }
  0x25   : > { %546 = vmatprep.subr.mxu0 %v234_v24  ;;  %579 = vmatprep.subr.mxu1 %v234_v24 }
  0x26   : > { %547 = vmatpush3.msra.mxu0 %v218_v25  ;;  %595 = vmatpush3.msra.mxu1 %v218_v25 }
  0x27   : > { %548 = vmatprep.subr.mxu0 %v233_v26  ;;  %580 = vmatprep.subr.mxu1 %v233_v26 }
  0x28   : > { %549 = vmatpush3.msra.mxu0 %v217_v27  ;;  %596 = vmatpush3.msra.mxu1 %v217_v27 }
  0x29   : > { %550 = vmatprep.subr.mxu0 %v232_v28  ;;  %581 = vmatprep.subr.mxu1 %v232_v28 }
  0x2a   : > { %551 = vmatpush3.msra.mxu0 %v216_v29  ;;  %597 = vmatpush3.msra.mxu1 %v216_v29 }
  0x2b   : > { %552 = vmatprep.subr.mxu0 %v231_v30  ;;  %582 = vmatprep.subr.mxu1 %v231_v30 }
  0x2c   : > { %553 = vmatpush3.msra.mxu0 %v215_v31  ;;  %598 = vmatpush3.msra.mxu1 %v215_v31 }
  0x2d   : > { %554 = vmatprep.subr.mxu0 %v230_v32  ;;  %583 = vmatprep.subr.mxu1 %v230_v32 }
  0x2e   : > { %555 = vmatpush3.msra.mxu0 %v214_v33  ;;  %599 = vmatpush3.msra.mxu1 %v214_v33 }
  0x2f   : > { %311 = vmatmul.mubr.f32.vlgmr.msra.gmra.mxu0 %v198_v34  ;;  %321 = vmatmul.mubr.f32.vlgmr.msra.gmra.mxu1 %v202_v35 }
  0x30   : > { %315 = vmatprep.mubr.f32.mxu0 %v201_v36  ;;  %325 = vmatprep.mubr.f32.mxu1 %v205_v37 }
  0x33   : > { %316 = vmatmul.mubr.f32.gmra.mxu0 %v200_v38  ;;  %326 = vmatmul.mubr.f32.gmra.mxu1 %v204_v39 }
  0xef   : > { %v556_v41 = vpop.f32.mrf.mxu0  ;;  %v562_v42 = vpop.f32.mrf.mxu1 }
  0xf1   : > { %v557_v43 = vpop.f32.mrf.mxu0  ;;  %v563_v44 = vpop.f32.mrf.mxu1 }
  0xf2   : > { %v725_v45 = vadd.f32 %v557_v43, %v556_v41  ;;  %v727_v46 = vadd.f32 %v563_v44, %v562_v42 }
  0xf3   : > { %v559_v47 = vpop.f32.mrf.mxu0  ;;  %v565_v0 = vpop.f32.mrf.mxu1 }
  0xf4   : > { %v338_v48 = vsel %vm331_vm0, %v727_v46, 0.0  ;;  %v332_v49 = vsel %vm331_vm0, %v725_v45, 0.0  ;;  %v344_v50 = vmul.f32 %v725_v45, %v725_v45  ;;  %v346_v53 = vmul.f32 %v727_v46, %v727_v46 }
  0xf5   : > { %339 = vadd.xlane.f32.xlu1 %v338_v48  ;;  %333 = vadd.xlane.f32.xlu0 %v332_v49  ;;  %v560_v52 = vpop.f32.mrf.mxu0  ;;  %v566_v1 = vpop.f32.mrf.mxu1 }
  0xf6   : > { %v348_v51 = vsel %vm331_vm0, %v344_v50, 0.0  ;;  %v738_v54 = vadd.f32 %v560_v52, %v559_v47  ;;  %v354_v55 = vsel %vm331_vm0, %v346_v53, 0.0  ;;  %v764_v2 = vadd.f32 %v566_v1, %v565_v0 }
  0xf8   : > { %v335_v56 = vsel %vm331_vm0, %v738_v54, 0.0  ;;  %v341_v3 = vsel %vm331_vm0, %v764_v2, 0.0  ;;  %v345_v4 = vmul.f32 %v738_v54, %v738_v54  ;;  %v347_v6 = vmul.f32 %v764_v2, %v764_v2 }
  0xf9   : > { %349 = vadd.xlane.f32.xlu0 %v348_v51 }
  0xfa   : > { %v351_v5 = vsel %vm331_vm0, %v345_v4, 0.0  ;;  %v357_v7 = vsel %vm331_vm0, %v347_v6, 0.0 }
  0xfd   : > { %355 = vadd.xlane.f32.xlu0 %v354_v55 }
 0x101   : > { %336 = vadd.xlane.f32.xlu0 %v335_v56 }
 0x106   : > { %399 = vperm.xlu1 %610, %v207_v57  }
 0x10a   : > { %404 = vperm.xlu1 %610, %v208_v58  }
 0x10e   : > { %409 = vperm.xlu1 %610, %v209_v59  }
 0x112   : > { %418 = vperm.xlu1 %610, %v210_v60  }
 0x116   : > { %423 = vperm.xlu1 %610, %v211_v61  }
 0x117   : > { %394 = vperm.xlu0 %609, %v206_v62  }
 0x11a   : > { %428 = vperm.xlu1 %610, %v212_v63  }
 0x13e   : > { %342 = vadd.xlane.f32.xlu1 %v341_v3 }
 0x142   : > { %352 = vadd.xlane.f32.xlu1 %v351_v5 }
 0x146   : > { %358 = vadd.xlane.f32.xlu1 %v357_v7 }
 0x157   : > { %433 = vperm.xlu1 %610, %v213_v8  }
 0x17e   : > { %v340_v9 = vpop.xlane.xlu1 %339  ;;  %v334_v10 = vpop.xlane.xlu0 %333 }
 0x17f   : > { %v360_v11 = vmul.f32 0.015625, %v334_v10  ;;  %v362_v15 = vmul.f32 0.015625, %v340_v9 }
 0x181   : > { %v368_v12 = vmul.f32 %v360_v11, %v360_v11  ;;  %v370_v20 = vmul.f32 %v362_v15, %v362_v15  ;;  %v376_v28 = vsub.f32 %v725_v45, %v360_v11  ;;  %v378_v33 = vsub.f32 %v727_v46, %v362_v15 }
 0x182   : > { %v400_v13 = vpop.permute.xlu1 %399  ;;  %v350_v14 = vpop.xlane.xlu0 %349 }
 0x183   : > { %v364_v16 = vmul.f32 0.015625, %v350_v14 }
 0x185   : > { %v372_v17 = vsub.f32 %v364_v16, %v368_v12 }
 0x186   : > { %v405_v18 = vpop.permute.xlu1 %404  ;;  %v356_v19 = vpop.xlane.xlu0 %355 }
 0x187   : > { %v380_v21 = vadd.f32 1e-05, %v372_v17  ;;  %v366_v22 = vmul.f32 0.015625, %v356_v19 }
 0x189   : > { %611 = vrsqrt.f32 %v380_v21  ;;  %v374_v23 = vsub.f32 %v366_v22, %v370_v20 }
 0x18a   : > { %v410_v25 = vpop.permute.xlu1 %409  ;;  %v337_v26 = vpop.xlane.xlu0 %336 }
 0x18b   : > { %v382_v24 = vadd.f32 1e-05, %v374_v23  ;;  %v361_v46 = vmul.f32 0.015625, %v337_v26 }
 0x18d   : > { %613 = vrsqrt.f32 %v382_v24  ;;  %v369_v48 = vmul.f32 %v361_v46, %v361_v46  ;;  %v377_v59 = vsub.f32 %v738_v54, %v361_v46 }
 0x18e   : > { %v419_v27 = vpop.permute.xlu1 %418 }
 0x192   : > { %v395_v30 = vpop.permute.xlu0 %394  ;;  %v424_v32 = vpop.permute.xlu1 %423 }
 0x196   : > { %v612_v29 = vpop.eup %611  ;;  %v429_v40 = vpop.permute.xlu1 %428 }
 0x197   : > { %v388_v31 = vmul.f32 %v612_v29, %v376_v28 }
 0x199   : > { %v412_v34 = vmul.f32 %v395_v30, %v388_v31 }
 0x19a   : > { %v614_v35 = vpop.eup %613 }
 0x19b   : > { %v390_v36 = vmul.f32 %v614_v35, %v378_v33  ;;  %v436_v37 = vadd.f32 %v419_v27, %v412_v34 }
 0x19d   : > { %v414_v38 = vmul.f32 %v405_v18, %v390_v36  ;;  %vm440_vm1 = vcmp.gt.f32.partialorder %v436_v37, 0.0  ;;  %v444_v39 = vmul.f32 0.2, %v436_v37 }
 0x19f   : > { %v438_v41 = vadd.f32 %v429_v40, %v414_v38  ;;  %v448_v42 = vsel %vm440_vm1, %v436_v37, %v444_v39 }
 0x1a0   : > { %452 = vst.msk [vmem:[%s783_s6] sm:$0xff] %vm331_vm0, %v448_v42 }
 0x1a1   : > { %vm442_vm2 = vcmp.gt.f32.partialorder %v438_v41, 0.0  ;;  %v446_v43 = vmul.f32 0.2, %v438_v41 }
 0x1a3   : > { %v450_v44 = vsel %vm442_vm2, %v438_v41, %v446_v43 }
 0x1a4   : > { %454 = vst.msk [vmem:[%s783_s6 + $0x10] sm:$0xff] %vm331_vm0, %v450_v44 }
 0x1c7   : > { %v343_v45 = vpop.xlane.xlu1 %342 }
 0x1c8   : > { %v363_v49 = vmul.f32 0.015625, %v343_v45 }
 0x1ca   : > { %v371_v53 = vmul.f32 %v363_v49, %v363_v49  ;;  %v379_v62 = vsub.f32 %v764_v2, %v363_v49 }
 0x1cb   : > { %v353_v47 = vpop.xlane.xlu1 %352 }
 0x1cc   : > { %v365_v50 = vmul.f32 0.015625, %v353_v47 }
 0x1ce   : > { %v373_v51 = vsub.f32 %v365_v50, %v369_v48 }
 0x1cf   : > { %v359_v52 = vpop.xlane.xlu1 %358 }
 0x1d0   : > { %v381_v55 = vadd.f32 1e-05, %v373_v51  ;;  %v367_v56 = vmul.f32 0.015625, %v359_v52 }
 0x1d2   : > { %615 = vrsqrt.f32 %v381_v55  ;;  %v375_v57 = vsub.f32 %v367_v56, %v371_v53 }
 0x1d3   : > { %v434_v6 = vpop.permute.xlu1 %433 }
 0x1d4   : > { %v383_v58 = vadd.f32 1e-05, %v375_v57 }
 0x1d6   : > { %617 = vrsqrt.f32 %v383_v58 }
 0x1df   : > { %v616_v60 = vpop.eup %615 }
 0x1e0   : > { %v389_v61 = vmul.f32 %v616_v60, %v377_v59 }
 0x1e2   : > { %v413_v63 = vmul.f32 %v400_v13, %v389_v61 }
 0x1e3   : > { %v618_v0 = vpop.eup %617 }
 0x1e4   : > { %v437_v1 = vadd.f32 %v424_v32, %v413_v63  ;;  %v391_v3 = vmul.f32 %v618_v0, %v379_v62 }
 0x1e6   : > { %vm441_vm3 = vcmp.gt.f32.partialorder %v437_v1, 0.0  ;;  %v445_v4 = vmul.f32 0.2, %v437_v1  ;;  %v415_v5 = vmul.f32 %v410_v25, %v391_v3 }
 0x1e8   : > { %v449_v7 = vsel %vm441_vm3, %v437_v1, %v445_v4  ;;  %v439_v8 = vadd.f32 %v434_v6, %v415_v5 }
 0x1e9   : > { %453 = vst.msk [vmem:[%s783_s6 + $0x8] sm:$0xff] %vm331_vm0, %v449_v7 }
 0x1ea   : > { %vm443_vm4 = vcmp.gt.f32.partialorder %v439_v8, 0.0  ;;  %v447_v9 = vmul.f32 0.2, %v439_v8 }
 0x1ec   : > { %v451_v54 = vsel %vm443_vm4, %v439_v8, %v447_v9 }
 0x1ed   : > { %455 = vst.msk [vmem:[%s783_s6 + $0x18] sm:$0xff] %vm331_vm0, %v451_v54 }
 0x1ee PF: > { %s14_s15 = sadd.s32 1, %s625_s15  }
 0x1ef   : > { %p11_p4 = scmp.ge.s32.totalorder %s14_s15, 4  }
 0x1f1   :  { %13 = sbr.rel (!%p11_p4) target bundleno = 1 (0x1), region = 66 }

// kernel: critic_forward.7
= control target key start
LH: loop header
LB: loop body
LE: loop exit
PB: predicated region body
PF: predicated region fallthrough
CT: control target
= control target key end

     0   :  { %s1103_s23 = smov 0   ;;  %s1484_s0 = inlined_call_operand.vmem [shape: f32[2,512,16], index: 0, kind: input, shape index: {}]   ;;  %s1485_s1 = inlined_call_operand.vmem [shape: f32[64,512], index: 1, kind: input, shape index: {}]   ;;  %s1486_s2 = inlined_call_operand.vmem [shape: f32[64,1], index: 2, kind: input, shape index: {}]   ;;  %s1487_s3 = inlined_call_operand.vmem [shape: f32[64,1], index: 3, kind: input, shape index: {}]   ;;  %s1488_s4 = inlined_call_operand.vmem [shape: f32[64,16], index: 4, kind: input, shape index: {}]   ;;  %s1489_s5 = inlined_call_operand.<no memory space> [shape: f32[1,1], index: 5, kind: input, shape index: {}]   ;;  %s1490_s6 = inlined_call_operand.vmem [shape: f32[2,1,1], index: 6, kind: output, shape index: {}]  }
   0x1   :  { %v11_v0 = vstv %s1489_s5 }
   0x2   :  { %12 = vst [vmem:[#allocation2] sm:$0x1] %v11_v0 }
   0x3 LB: > { %s905_s24 = sadd.s32 4294967295, %s1062_s23   ;;  %p909_p0 = scmp.ge.s32.totalorder %s1062_s23, 1  ;;  %s1062_s23 = sphi %s1103_s23, %s18_s23  }
   0x4   : > { %p214_p1 = scmp.lt.s32.totalorder %s1062_s23, 3 }
   0x6   : > { %p215_p2 = pnand %p909_p0, %p214_p1 }
   0x7   : > { %p242_p3 = scmp.lt.s32.totalorder (!%p215_p2), %s905_s24, 1 }
   0x8   : > { %218 = sbr.rel (%p215_p2) target bundleno = 659 (0x293), region = 44 }
   0xd   : > { %v251_v1 = vld [vmem:[%s1485_s1 + $0x8] sm:$0xff]  ;;  %v253_v2 = vld [vmem:[%s1485_s1 + $0x18] sm:$0xff]  ;;  %s1492_s24 = smov (!%p242_p3, %s905_s24), 1  ;;  %v1064_v3 = vmov 0   ;;  %vm581_vm0 = vcmask 130048   ;;  %vm856_vm9 = vcmask 0  }
   0xe   : > { %435 = vmatprep.mubr.f32.mxu0 %v251_v1  ;;  %540 = vmatprep.mubr.f32.mxu1 %v253_v2  ;;  %s914_s28 = sshll.u32 %s1492_s24, 9 }
   0xf   : > { %1039 = vset.pattern.permute.xlu1 %v1064_v3  ;;  %1038 = vset.pattern.permute.xlu0 %v1064_v3  ;;  %s1123_s7 = scalar_lea.vmem %s1484_s0, %s914_s28  ;;  %s249_s28 = scalar_lea.vmem %s1490_s6, %s1492_s24 }
  0x10   : > { %v338_v4 = vld [vmem:[%s1123_s7 + $0xf8] sm:$0xff]  ;;  %v337_v8 = vld [vmem:[%s1123_s7 + $0xf0] sm:$0xff]  ;;  %v336_v12 = vld [vmem:[%s1123_s7 + $0xe8] sm:$0xff] }
  0x11   : > { %v370_v5 = vld [vmem:[%s1123_s7 + $0x1f8] sm:$0xff]  ;;  %915 = vmatprep.subr.mxu0 %v338_v4  ;;  %v369_v9 = vld [vmem:[%s1123_s7 + $0x1f0] sm:$0xff]  ;;  %v368_v13 = vld [vmem:[%s1123_s7 + $0x1e8] sm:$0xff] }
  0x12   : > { %v322_v6 = vld [vmem:[%s1123_s7 + $0x78] sm:$0xff]  ;;  %971 = vmatprep.subr.mxu1 %v370_v5  ;;  %v321_v10 = vld [vmem:[%s1123_s7 + $0x70] sm:$0xff]  ;;  %v320_v14 = vld [vmem:[%s1123_s7 + $0x68] sm:$0xff] }
  0x13   : > { %v354_v7 = vld [vmem:[%s1123_s7 + $0x178] sm:$0xff]  ;;  %916 = vmatpush3.msra.mxu0 %v322_v6  ;;  %v353_v11 = vld [vmem:[%s1123_s7 + $0x170] sm:$0xff]  ;;  %v352_v15 = vld [vmem:[%s1123_s7 + $0x168] sm:$0xff] }
  0x14   : > { %972 = vmatpush3.msra.mxu1 %v354_v7  ;;  %917 = vmatprep.subr.mxu0 %v337_v8  ;;  %v335_v16 = vld [vmem:[%s1123_s7 + $0xe0] sm:$0xff]  ;;  %v334_v20 = vld [vmem:[%s1123_s7 + $0xd8] sm:$0xff]  ;;  %v333_v24 = vld [vmem:[%s1123_s7 + $0xd0] sm:$0xff] }
  0x15   : > { %973 = vmatprep.subr.mxu1 %v369_v9  ;;  %918 = vmatpush3.msra.mxu0 %v321_v10  ;;  %v367_v17 = vld [vmem:[%s1123_s7 + $0x1e0] sm:$0xff]  ;;  %v366_v21 = vld [vmem:[%s1123_s7 + $0x1d8] sm:$0xff]  ;;  %v365_v25 = vld [vmem:[%s1123_s7 + $0x1d0] sm:$0xff] }
  0x16   : > { %974 = vmatpush3.msra.mxu1 %v353_v11  ;;  %919 = vmatprep.subr.mxu0 %v336_v12  ;;  %v319_v18 = vld [vmem:[%s1123_s7 + $0x60] sm:$0xff]  ;;  %v318_v22 = vld [vmem:[%s1123_s7 + $0x58] sm:$0xff]  ;;  %v317_v26 = vld [vmem:[%s1123_s7 + $0x50] sm:$0xff] }
  0x17   : > { %975 = vmatprep.subr.mxu1 %v368_v13  ;;  %v351_v19 = vld [vmem:[%s1123_s7 + $0x160] sm:$0xff]  ;;  %920 = vmatpush3.msra.mxu0 %v320_v14  ;;  %v350_v23 = vld [vmem:[%s1123_s7 + $0x158] sm:$0xff]  ;;  %v349_v27 = vld [vmem:[%s1123_s7 + $0x150] sm:$0xff] }
  0x18   : > { %976 = vmatpush3.msra.mxu1 %v352_v15  ;;  %921 = vmatprep.subr.mxu0 %v335_v16  ;;  %v332_v28 = vld [vmem:[%s1123_s7 + $0xc8] sm:$0xff]  ;;  %v331_v32 = vld [vmem:[%s1123_s7 + $0xc0] sm:$0xff]  ;;  %v330_v36 = vld [vmem:[%s1123_s7 + $0xb8] sm:$0xff] }
  0x19   : > { %977 = vmatprep.subr.mxu1 %v367_v17  ;;  %922 = vmatpush3.msra.mxu0 %v319_v18  ;;  %v364_v29 = vld [vmem:[%s1123_s7 + $0x1c8] sm:$0xff]  ;;  %v363_v33 = vld [vmem:[%s1123_s7 + $0x1c0] sm:$0xff]  ;;  %v362_v37 = vld [vmem:[%s1123_s7 + $0x1b8] sm:$0xff] }
  0x1a   : > { %978 = vmatpush3.msra.mxu1 %v351_v19  ;;  %923 = vmatprep.subr.mxu0 %v334_v20  ;;  %v316_v30 = vld [vmem:[%s1123_s7 + $0x48] sm:$0xff]  ;;  %v315_v34 = vld [vmem:[%s1123_s7 + $0x40] sm:$0xff]  ;;  %v314_v38 = vld [vmem:[%s1123_s7 + $0x38] sm:$0xff] }
  0x1b   : > { %979 = vmatprep.subr.mxu1 %v366_v21  ;;  %924 = vmatpush3.msra.mxu0 %v318_v22  ;;  %v348_v31 = vld [vmem:[%s1123_s7 + $0x148] sm:$0xff]  ;;  %v347_v35 = vld [vmem:[%s1123_s7 + $0x140] sm:$0xff]  ;;  %v346_v39 = vld [vmem:[%s1123_s7 + $0x138] sm:$0xff] }
  0x1c   : > { %980 = vmatpush3.msra.mxu1 %v350_v23  ;;  %925 = vmatprep.subr.mxu0 %v333_v24  ;;  %v329_v40 = vld [vmem:[%s1123_s7 + $0xb0] sm:$0xff]  ;;  %v328_v44 = vld [vmem:[%s1123_s7 + $0xa8] sm:$0xff]  ;;  %v327_v48 = vld [vmem:[%s1123_s7 + $0xa0] sm:$0xff] }
  0x1d   : > { %981 = vmatprep.subr.mxu1 %v365_v25  ;;  %926 = vmatpush3.msra.mxu0 %v317_v26  ;;  %v361_v41 = vld [vmem:[%s1123_s7 + $0x1b0] sm:$0xff]  ;;  %v360_v45 = vld [vmem:[%s1123_s7 + $0x1a8] sm:$0xff]  ;;  %v359_v49 = vld [vmem:[%s1123_s7 + $0x1a0] sm:$0xff] }
  0x1e   : > { %982 = vmatpush3.msra.mxu1 %v349_v27  ;;  %927 = vmatprep.subr.mxu0 %v332_v28  ;;  %v313_v42 = vld [vmem:[%s1123_s7 + $0x30] sm:$0xff]  ;;  %v312_v46 = vld [vmem:[%s1123_s7 + $0x28] sm:$0xff]  ;;  %v311_v50 = vld [vmem:[%s1123_s7 + $0x20] sm:$0xff] }
  0x1f   : > { %983 = vmatprep.subr.mxu1 %v364_v29  ;;  %928 = vmatpush3.msra.mxu0 %v316_v30  ;;  %v345_v43 = vld [vmem:[%s1123_s7 + $0x130] sm:$0xff]  ;;  %v344_v47 = vld [vmem:[%s1123_s7 + $0x128] sm:$0xff]  ;;  %v343_v51 = vld [vmem:[%s1123_s7 + $0x120] sm:$0xff] }
  0x20   : > { %984 = vmatpush3.msra.mxu1 %v348_v31  ;;  %929 = vmatprep.subr.mxu0 %v331_v32  ;;  %v326_v52 = vld [vmem:[%s1123_s7 + $0x98] sm:$0xff]  ;;  %v325_v56 = vld [vmem:[%s1123_s7 + $0x90] sm:$0xff]  ;;  %v324_v60 = vld [vmem:[%s1123_s7 + $0x88] sm:$0xff] }
  0x21   : > { %985 = vmatprep.subr.mxu1 %v363_v33  ;;  %930 = vmatpush3.msra.mxu0 %v315_v34  ;;  %v358_v53 = vld [vmem:[%s1123_s7 + $0x198] sm:$0xff]  ;;  %v357_v57 = vld [vmem:[%s1123_s7 + $0x190] sm:$0xff]  ;;  %v356_v61 = vld [vmem:[%s1123_s7 + $0x188] sm:$0xff] }
  0x22   : > { %986 = vmatpush3.msra.mxu1 %v347_v35  ;;  %931 = vmatprep.subr.mxu0 %v330_v36  ;;  %v310_v54 = vld [vmem:[%s1123_s7 + $0x18] sm:$0xff]  ;;  %v309_v58 = vld [vmem:[%s1123_s7 + $0x10] sm:$0xff]  ;;  %v308_v62 = vld [vmem:[%s1123_s7 + $0x8] sm:$0xff] }
  0x23   : > { %987 = vmatprep.subr.mxu1 %v362_v37  ;;  %932 = vmatpush3.msra.mxu0 %v314_v38  ;;  %v342_v55 = vld [vmem:[%s1123_s7 + $0x118] sm:$0xff]  ;;  %v341_v59 = vld [vmem:[%s1123_s7 + $0x110] sm:$0xff]  ;;  %v340_v63 = vld [vmem:[%s1123_s7 + $0x108] sm:$0xff] }
  0x24   : > { %988 = vmatpush3.msra.mxu1 %v346_v39  ;;  %933 = vmatprep.subr.mxu0 %v329_v40  ;;  %v323_v0 = vld [vmem:[%s1123_s7 + $0x80] sm:$0xff]  ;;  %v252_v5 = vld [vmem:[%s1485_s1 + $0x10] sm:$0xff]  ;;  %v255_v6 = vld [vmem:[%s1485_s1 + $0x28] sm:$0xff] }
  0x25   : > { %989 = vmatprep.subr.mxu1 %v361_v41  ;;  %934 = vmatpush3.msra.mxu0 %v313_v42  ;;  %v355_v1 = vld [vmem:[%s1123_s7 + $0x180] sm:$0xff]  ;;  %v257_v7 = vld [vmem:[%s1485_s1 + $0x38] sm:$0xff]  ;;  %v283_v8 = vld [vmem:[%s1486_s2 + $0x8] sm:$0xff] }
  0x26   : > { %990 = vmatpush3.msra.mxu1 %v345_v43  ;;  %935 = vmatprep.subr.mxu0 %v328_v44  ;;  %v307_v2 = vld [vmem:[%s1123_s7] sm:$0xff]  ;;  %v256_v11 = vld [vmem:[%s1485_s1 + $0x30] sm:$0xff]  ;;  %v259_v12 = vld [vmem:[%s1485_s1 + $0x48] sm:$0xff] }
  0x27   : > { %991 = vmatprep.subr.mxu1 %v360_v45  ;;  %936 = vmatpush3.msra.mxu0 %v312_v46  ;;  %v339_v3 = vld [vmem:[%s1123_s7 + $0x100] sm:$0xff]  ;;  %v261_v13 = vld [vmem:[%s1485_s1 + $0x58] sm:$0xff]  ;;  %v284_v14 = vld [vmem:[%s1486_s2 + $0x10] sm:$0xff] }
  0x28   : > { %992 = vmatpush3.msra.mxu1 %v344_v47  ;;  %937 = vmatprep.subr.mxu0 %v327_v48  ;;  %v250_v4 = vld [vmem:[%s1485_s1] sm:$0xff]  ;;  %v287_v15 = vld [vmem:[%s1486_s2 + $0x28] sm:$0xff]  ;;  %v260_v17 = vld [vmem:[%s1485_s1 + $0x50] sm:$0xff] }
  0x29   : > { %993 = vmatprep.subr.mxu1 %v359_v49  ;;  %938 = vmatpush3.msra.mxu0 %v311_v50  ;;  %v282_v9 = vld [vmem:[%s1486_s2] sm:$0xff]  ;;  %v263_v18 = vld [vmem:[%s1485_s1 + $0x68] sm:$0xff]  ;;  %v265_v19 = vld [vmem:[%s1485_s1 + $0x78] sm:$0xff] }
  0x2a   : > { %994 = vmatpush3.msra.mxu1 %v343_v51  ;;  %939 = vmatprep.subr.mxu0 %v326_v52  ;;  %v254_v10 = vld [vmem:[%s1485_s1 + $0x20] sm:$0xff]  ;;  %v288_v21 = vld [vmem:[%s1486_s2 + $0x30] sm:$0xff]  ;;  %v267_v24 = vld [vmem:[%s1485_s1 + $0x88] sm:$0xff] }
  0x2b   : > { %995 = vmatprep.subr.mxu1 %v358_v53  ;;  %940 = vmatpush3.msra.mxu0 %v310_v54  ;;  %v258_v16 = vld [vmem:[%s1485_s1 + $0x40] sm:$0xff]  ;;  %v264_v23 = vld [vmem:[%s1485_s1 + $0x70] sm:$0xff]  ;;  %v269_v25 = vld [vmem:[%s1485_s1 + $0x98] sm:$0xff] }
  0x2c   : > { %996 = vmatpush3.msra.mxu1 %v342_v55  ;;  %941 = vmatprep.subr.mxu0 %v325_v56  ;;  %v290_v20 = vld [vmem:[%s1487_s3] sm:$0xff]  ;;  %v291_v26 = vld [vmem:[%s1487_s3 + $0x8] sm:$0xff]  ;;  %v268_v28 = vld [vmem:[%s1485_s1 + $0x90] sm:$0xff] }
  0x2d   : > { %997 = vmatprep.subr.mxu1 %v357_v57  ;;  %942 = vmatpush3.msra.mxu0 %v309_v58  ;;  %v262_v22 = vld [vmem:[%s1485_s1 + $0x60] sm:$0xff]  ;;  %v271_v29 = vld [vmem:[%s1485_s1 + $0xa8] sm:$0xff]  ;;  %v273_v30 = vld [vmem:[%s1485_s1 + $0xb8] sm:$0xff] }
  0x2e   : > { %998 = vmatpush3.msra.mxu1 %v341_v59  ;;  %943 = vmatprep.subr.mxu0 %v324_v60  ;;  %v266_v27 = vld [vmem:[%s1485_s1 + $0x80] sm:$0xff]  ;;  %v285_v31 = vld [vmem:[%s1486_s2 + $0x18] sm:$0xff]  ;;  %v272_v33 = vld [vmem:[%s1485_s1 + $0xb0] sm:$0xff] }
  0x2f   : > { %999 = vmatprep.subr.mxu1 %v356_v61  ;;  %944 = vmatpush3.msra.mxu0 %v308_v62  ;;  %v270_v32 = vld [vmem:[%s1485_s1 + $0xa0] sm:$0xff]  ;;  %v275_v34 = vld [vmem:[%s1485_s1 + $0xc8] sm:$0xff]  ;;  %v277_v35 = vld [vmem:[%s1485_s1 + $0xd8] sm:$0xff] }
  0x30   : > { %1000 = vmatpush3.msra.mxu1 %v340_v63  ;;  %945 = vmatprep.subr.mxu0 %v323_v0  ;;  %v292_v36 = vld [vmem:[%s1487_s3 + $0x10] sm:$0xff]  ;;  %v274_v37 = vld [vmem:[%s1485_s1 + $0xc0] sm:$0xff]  ;;  %v279_v39 = vld [vmem:[%s1485_s1 + $0xe8] sm:$0xff] }
  0x31   : > { %1001 = vmatprep.subr.mxu1 %v355_v1  ;;  %946 = vmatpush3.msra.mxu0 %v307_v2  ;;  %v276_v38 = vld [vmem:[%s1485_s1 + $0xd0] sm:$0xff]  ;;  %v281_v40 = vld [vmem:[%s1485_s1 + $0xf8] sm:$0xff]  ;;  %v286_v41 = vld [vmem:[%s1486_s2 + $0x20] sm:$0xff] }
  0x32   : > { %1002 = vmatpush3.msra.mxu1 %v339_v3  ;;  %436 = vmatmul.mubr.f32.vlgmr.msra.gmra.mxu0 %v250_v4  ;;  %v278_v42 = vld [vmem:[%s1485_s1 + $0xe0] sm:$0xff]  ;;  %v280_v43 = vld [vmem:[%s1485_s1 + $0xf0] sm:$0xff]  ;;  %v293_v44 = vld [vmem:[%s1487_s3 + $0x18] sm:$0xff] }
  0x33   : > { %541 = vmatmul.mubr.f32.vlgmr.msra.gmra.mxu1 %v252_v5  ;;  %440 = vmatprep.mubr.f32.mxu0 %v255_v6  ;;  %v294_v45 = vld [vmem:[%s1487_s3 + $0x20] sm:$0xff]  ;;  %v295_v46 = vld [vmem:[%s1487_s3 + $0x28] sm:$0xff] }
  0x34   : > { %545 = vmatprep.mubr.f32.mxu1 %v257_v7  ;;  %709 = vperm.xlu1 %1039, %v283_v8  }
  0x35   : > { %704 = vperm.xlu0 %1038, %v282_v9  }
  0x36   : > { %441 = vmatmul.mubr.f32.gmra.mxu0 %v254_v10 }
  0x37   : > { %546 = vmatmul.mubr.f32.gmra.mxu1 %v256_v11  ;;  %445 = vmatprep.mubr.f32.mxu0 %v259_v12 }
  0x38   : > { %550 = vmatprep.mubr.f32.mxu1 %v261_v13  ;;  %714 = vperm.xlu1 %1039, %v284_v14  }
  0x39   : > { %729 = vperm.xlu0 %1038, %v287_v15  }
  0x3a   : > { %446 = vmatmul.mubr.f32.gmra.mxu0 %v258_v16 }
  0x3b   : > { %551 = vmatmul.mubr.f32.gmra.mxu1 %v260_v17  ;;  %450 = vmatprep.mubr.f32.mxu0 %v263_v18 }
  0x3c   : > { %555 = vmatprep.mubr.f32.mxu1 %v265_v19  ;;  %752 = vperm.xlu1 %1039, %v290_v20  }
  0x3d   : > { %734 = vperm.xlu0 %1038, %v288_v21  }
  0x3e   : > { %451 = vmatmul.mubr.f32.gmra.mxu0 %v262_v22 }
  0x3f   : > { %556 = vmatmul.mubr.f32.gmra.mxu1 %v264_v23  ;;  %455 = vmatprep.mubr.f32.mxu0 %v267_v24 }
  0x40   : > { %560 = vmatprep.mubr.f32.mxu1 %v269_v25  ;;  %757 = vperm.xlu1 %1039, %v291_v26  }
  0x42   : > { %456 = vmatmul.mubr.f32.gmra.mxu0 %v266_v27 }
  0x43   : > { %561 = vmatmul.mubr.f32.gmra.mxu1 %v268_v28  ;;  %460 = vmatprep.mubr.f32.mxu0 %v271_v29 }
  0x44   : > { %565 = vmatprep.mubr.f32.mxu1 %v273_v30  ;;  %719 = vperm.xlu1 %1039, %v285_v31  }
  0x46   : > { %461 = vmatmul.mubr.f32.gmra.mxu0 %v270_v32 }
  0x47   : > { %566 = vmatmul.mubr.f32.gmra.mxu1 %v272_v33  ;;  %465 = vmatprep.mubr.f32.mxu0 %v275_v34 }
  0x48   : > { %570 = vmatprep.mubr.f32.mxu1 %v277_v35  ;;  %762 = vperm.xlu1 %1039, %v292_v36  }
  0x4a   : > { %466 = vmatmul.mubr.f32.gmra.mxu0 %v274_v37 }
  0x4b   : > { %571 = vmatmul.mubr.f32.gmra.mxu1 %v276_v38  ;;  %470 = vmatprep.mubr.f32.mxu0 %v279_v39 }
  0x4c   : > { %575 = vmatprep.mubr.f32.mxu1 %v281_v40  ;;  %724 = vperm.xlu1 %1039, %v286_v41  }
  0x4e   : > { %471 = vmatmul.mubr.f32.gmra.mxu0 %v278_v42 }
  0x4f   : > { %576 = vmatmul.mubr.f32.gmra.mxu1 %v280_v43 }
  0x50   : > { %767 = vperm.xlu1 %1039, %v293_v44  }
  0x54   : > { %772 = vperm.xlu1 %1039, %v294_v45  }
  0x58   : > { %777 = vperm.xlu1 %1039, %v295_v46  }
  0xf2   : > { %v947_v47 = vpop.f32.mrf.mxu0 }
  0xf3   : > { %v1003_v48 = vpop.f32.mrf.mxu1 }
  0xf4   : > { %v948_v49 = vpop.f32.mrf.mxu0 }
  0xf5   : > { %v1004_v50 = vpop.f32.mrf.mxu1  ;;  %v949_v51 = vadd.f32 %v948_v49, %v947_v47 }
  0xf6   : > { %v1005_v52 = vadd.f32 %v1004_v50, %v1003_v48  ;;  %v950_v53 = vpop.f32.mrf.mxu0 }
  0xf7   : > { %v1006_v54 = vpop.f32.mrf.mxu1 }
  0xf8   : > { %v1318_v55 = vadd.f32 %v1005_v52, %v949_v51  ;;  %v951_v56 = vpop.f32.mrf.mxu0 }
  0xf9   : > { %v1007_v57 = vpop.f32.mrf.mxu1  ;;  %v952_v58 = vadd.f32 %v951_v56, %v950_v53 }
  0xfa   : > { %v1008_v59 = vadd.f32 %v1007_v57, %v1006_v54  ;;  %v582_v60 = vsel %vm581_vm0, %v1318_v55, 0.0  ;;  %v606_v61 = vmul.f32 %v1318_v55, %v1318_v55  ;;  %v953_v62 = vpop.f32.mrf.mxu0 }
  0xfb   : > { %v1009_v63 = vpop.f32.mrf.mxu1  ;;  %583 = vadd.xlane.f32.xlu0 %v582_v60 }
  0xfc   : > { %v1324_v0 = vadd.f32 %v1008_v59, %v952_v58  ;;  %v614_v1 = vsel %vm581_vm0, %v606_v61, 0.0  ;;  %v954_v2 = vpop.f32.mrf.mxu0 }
  0xfd   : > { %v1010_v3 = vpop.f32.mrf.mxu1  ;;  %615 = vadd.xlane.f32.xlu1 %v614_v1  ;;  %v955_v4 = vadd.f32 %v954_v2, %v953_v62  ;;  %v296_v1 = vld [vmem:[%s1487_s3 + $0x30] sm:$0xff]  ;;  %v289_v2 = vld [vmem:[%s1486_s2 + $0x38] sm:$0xff] }
  0xfe   : > { %v1011_v5 = vadd.f32 %v1010_v3, %v1009_v63  ;;  %v585_v6 = vsel %vm581_vm0, %v1324_v0, 0.0  ;;  %v607_v7 = vmul.f32 %v1324_v0, %v1324_v0  ;;  %v956_v8 = vpop.f32.mrf.mxu0  ;;  %v297_v3 = vld [vmem:[%s1487_s3 + $0x38] sm:$0xff] }
  0xff   : > { %v1012_v9 = vpop.f32.mrf.mxu1  ;;  %586 = vadd.xlane.f32.xlu0 %v585_v6 }
 0x100   : > { %v1331_v10 = vadd.f32 %v1011_v5, %v955_v4  ;;  %v957_v11 = vpop.f32.mrf.mxu0  ;;  %v617_v13 = vsel %vm581_vm0, %v607_v7, 0.0  ;;  %v1383_v4 = vpop.permute.xlu1 %709 }
 0x101   : > { %v1013_v12 = vpop.f32.mrf.mxu1  ;;  %v958_v14 = vadd.f32 %v957_v11, %v956_v8 }
 0x102   : > { %v1014_v15 = vadd.f32 %v1013_v12, %v1012_v9  ;;  %v588_v16 = vsel %vm581_vm0, %v1331_v10, 0.0  ;;  %v608_v17 = vmul.f32 %v1331_v10, %v1331_v10  ;;  %v959_v18 = vpop.f32.mrf.mxu0  ;;  %v1397_v12 = vpop.permute.xlu0 %704 }
 0x103   : > { %v1015_v19 = vpop.f32.mrf.mxu1  ;;  %589 = vadd.xlane.f32.xlu1 %v588_v16  ;;  %618 = vadd.xlane.f32.xlu0 %v617_v13 }
 0x104   : > { %v1338_v20 = vadd.f32 %v1014_v15, %v958_v14  ;;  %v960_v21 = vpop.f32.mrf.mxu0  ;;  %v620_v23 = vsel %vm581_vm0, %v608_v17, 0.0  ;;  %v1385_v5 = vpop.permute.xlu1 %714 }
 0x105   : > { %v1016_v22 = vpop.f32.mrf.mxu1  ;;  %v961_v24 = vadd.f32 %v960_v21, %v959_v18 }
 0x106   : > { %v1017_v25 = vadd.f32 %v1016_v22, %v1015_v19  ;;  %v591_v26 = vsel %vm581_vm0, %v1338_v20, 0.0  ;;  %v609_v27 = vmul.f32 %v1338_v20, %v1338_v20  ;;  %v962_v28 = vpop.f32.mrf.mxu0  ;;  %v1401_v14 = vpop.permute.xlu0 %729 }
 0x107   : > { %v1018_v29 = vpop.f32.mrf.mxu1  ;;  %592 = vadd.xlane.f32.xlu1 %v591_v26  ;;  %621 = vadd.xlane.f32.xlu0 %v620_v23 }
 0x108   : > { %v1345_v30 = vadd.f32 %v1017_v25, %v961_v24  ;;  %v963_v31 = vpop.f32.mrf.mxu0  ;;  %v623_v33 = vsel %vm581_vm0, %v609_v27, 0.0  ;;  %v1387_v6 = vpop.permute.xlu1 %752 }
 0x109   : > { %v1019_v32 = vpop.f32.mrf.mxu1  ;;  %v964_v34 = vadd.f32 %v963_v31, %v962_v28 }
 0x10a   : > { %v1020_v35 = vadd.f32 %v1019_v32, %v1018_v29  ;;  %v594_v36 = vsel %vm581_vm0, %v1345_v30, 0.0  ;;  %v610_v37 = vmul.f32 %v1345_v30, %v1345_v30  ;;  %v965_v38 = vpop.f32.mrf.mxu0  ;;  %v1405_v16 = vpop.permute.xlu0 %734 }
 0x10b   : > { %v1021_v39 = vpop.f32.mrf.mxu1  ;;  %595 = vadd.xlane.f32.xlu1 %v594_v36  ;;  %624 = vadd.xlane.f32.xlu0 %v623_v33 }
 0x10c   : > { %v1352_v40 = vadd.f32 %v1020_v35, %v964_v34  ;;  %v966_v41 = vpop.f32.mrf.mxu0  ;;  %v626_v43 = vsel %vm581_vm0, %v610_v37, 0.0  ;;  %v1389_v7 = vpop.permute.xlu1 %757 }
 0x10d   : > { %v1022_v42 = vpop.f32.mrf.mxu1  ;;  %v967_v44 = vadd.f32 %v966_v41, %v965_v38 }
 0x10e   : > { %v1023_v45 = vadd.f32 %v1022_v42, %v1021_v39  ;;  %v597_v46 = vsel %vm581_vm0, %v1352_v40, 0.0  ;;  %v611_v47 = vmul.f32 %v1352_v40, %v1352_v40  ;;  %v968_v48 = vpop.f32.mrf.mxu0 }
 0x10f   : > { %v1024_v49 = vpop.f32.mrf.mxu1  ;;  %598 = vadd.xlane.f32.xlu1 %v597_v46  ;;  %627 = vadd.xlane.f32.xlu0 %v626_v43 }
 0x110   : > { %v1359_v50 = vadd.f32 %v1023_v45, %v967_v44  ;;  %v969_v51 = vpop.f32.mrf.mxu0  ;;  %v629_v53 = vsel %vm581_vm0, %v611_v47, 0.0  ;;  %v1391_v8 = vpop.permute.xlu1 %719 }
 0x111   : > { %v1025_v52 = vpop.f32.mrf.mxu1  ;;  %v970_v54 = vadd.f32 %v969_v51, %v968_v48 }
 0x112   : > { %v1026_v56 = vadd.f32 %v1025_v52, %v1024_v49  ;;  %v600_v57 = vsel %vm581_vm0, %v1359_v50, 0.0  ;;  %v612_v58 = vmul.f32 %v1359_v50, %v1359_v50 }
 0x113   : > { %601 = vadd.xlane.f32.xlu1 %v600_v57  ;;  %630 = vadd.xlane.f32.xlu0 %v629_v53 }
 0x114   : > { %v1366_v59 = vadd.f32 %v1026_v56, %v970_v54  ;;  %v632_v61 = vsel %vm581_vm0, %v612_v58, 0.0  ;;  %v1393_v9 = vpop.permute.xlu1 %762 }
 0x116   : > { %v603_v60 = vsel %vm581_vm0, %v1366_v59, 0.0  ;;  %v613_v62 = vmul.f32 %v1366_v59, %v1366_v59 }
 0x117   : > { %604 = vadd.xlane.f32.xlu1 %v603_v60  ;;  %633 = vadd.xlane.f32.xlu0 %v632_v61 }
 0x118   : > { %v635_v63 = vsel %vm581_vm0, %v613_v62, 0.0  ;;  %v1395_v11 = vpop.permute.xlu1 %724 }
 0x11b   : > { %636 = vadd.xlane.f32.xlu1 %v635_v63 }
 0x11c   : > { %v1399_v13 = vpop.permute.xlu1 %767 }
 0x120   : > { %v1403_v15 = vpop.permute.xlu1 %772 }
 0x124   : > { %v1407_v17 = vpop.permute.xlu1 %777 }
 0x12c   : > { %782 = vperm.xlu1 %1039, %v296_v1  }
 0x12d   : > { %739 = vperm.xlu0 %1038, %v289_v2  }
 0x131   : > { %787 = vperm.xlu0 %1038, %v297_v3  }
 0x184   : > { %v584_v18 = vpop.xlane.xlu0 %583 }
 0x185   : > { %v638_v19 = vmul.f32 0.0625, %v584_v18 }
 0x186   : > { %v616_v21 = vpop.xlane.xlu1 %615 }
 0x187   : > { %v654_v22 = vmul.f32 %v638_v19, %v638_v19  ;;  %v646_v23 = vmul.f32 0.0625, %v616_v21  ;;  %v670_v2 = vsub.f32 %v1318_v55, %v638_v19 }
 0x188   : > { %v587_v24 = vpop.xlane.xlu0 %586 }
 0x189   : > { %v662_v25 = vsub.f32 %v646_v23, %v654_v22  ;;  %v639_v26 = vmul.f32 0.0625, %v587_v24 }
 0x18b   : > { %v678_v27 = vadd.f32 1e-05, %v662_v25  ;;  %v655_v31 = vmul.f32 %v639_v26, %v639_v26  ;;  %v671_v21 = vsub.f32 %v1324_v0, %v639_v26 }
 0x18c   : > { %v590_v28 = vpop.xlane.xlu1 %589  ;;  %v619_v29 = vpop.xlane.xlu0 %618 }
 0x18d   : > { %v640_v32 = vmul.f32 0.0625, %v590_v28  ;;  %v647_v33 = vmul.f32 0.0625, %v619_v29  ;;  %1040 = vrsqrt.f32 %v678_v27 }
 0x18f   : > { %v663_v34 = vsub.f32 %v647_v33, %v655_v31  ;;  %v656_v37 = vmul.f32 %v640_v32, %v640_v32  ;;  %v672_v55 = vsub.f32 %v1331_v10, %v640_v32 }
 0x190   : > { %v593_v35 = vpop.xlane.xlu1 %592  ;;  %v622_v36 = vpop.xlane.xlu0 %621 }
 0x191   : > { %v679_v38 = vadd.f32 1e-05, %v663_v34  ;;  %v641_v39 = vmul.f32 0.0625, %v593_v35  ;;  %v648_v41 = vmul.f32 0.0625, %v622_v36 }
 0x193   : > { %1042 = vrsqrt.f32 %v679_v38  ;;  %v664_v42 = vsub.f32 %v648_v41, %v656_v37  ;;  %v657_v45 = vmul.f32 %v641_v39, %v641_v39 }
 0x194   : > { %v596_v43 = vpop.xlane.xlu1 %595  ;;  %v625_v44 = vpop.xlane.xlu0 %624 }
 0x195   : > { %v680_v46 = vadd.f32 1e-05, %v664_v42  ;;  %v649_v47 = vmul.f32 0.0625, %v625_v44  ;;  %v642_v48 = vmul.f32 0.0625, %v596_v43  ;;  %v673_v44 = vsub.f32 %v1338_v20, %v641_v39 }
 0x197   : > { %1044 = vrsqrt.f32 %v680_v46  ;;  %v665_v49 = vsub.f32 %v649_v47, %v657_v45  ;;  %v658_v57 = vmul.f32 %v642_v48, %v642_v48 }
 0x198   : > { %v599_v51 = vpop.xlane.xlu1 %598  ;;  %v628_v52 = vpop.xlane.xlu0 %627 }
 0x199   : > { %v681_v53 = vadd.f32 1e-05, %v665_v49  ;;  %v1409_v54 = vmul.f32 0.0625, %v599_v51  ;;  %v650_v56 = vmul.f32 0.0625, %v628_v52  ;;  %v674_v52 = vsub.f32 %v1345_v30, %v642_v48 }
 0x19a   : > { %v1041_v62 = vpop.eup %1040 }
 0x19b   : > { %1046 = vrsqrt.f32 %v681_v53  ;;  %v666_v58 = vsub.f32 %v650_v56, %v658_v57  ;;  %v659_v63 = vmul.f32 %v1409_v54, %v1409_v54  ;;  %v694_v24 = vmul.f32 %v1041_v62, %v670_v2 }
 0x19c   : > { %v602_v60 = vpop.xlane.xlu1 %601  ;;  %v631_v61 = vpop.xlane.xlu0 %630 }
 0x19d   : > { %v651_v1 = vmul.f32 0.0625, %v631_v61  ;;  %v682_v3 = vadd.f32 1e-05, %v666_v58  ;;  %v1414_v18 = vmul.f32 0.0625, %v602_v60  ;;  %v742_v36 = vmul.f32 %v1397_v12, %v694_v24  ;;  %v300_v58 = vld [vmem:[%s1488_s4 + $0x10] sm:$0xff] }
 0x19f   : > { %v667_v22 = vsub.f32 %v651_v1, %v659_v63  ;;  %1048 = vrsqrt.f32 %v682_v3  ;;  %v660_v34 = vmul.f32 %v1414_v18, %v1414_v18  ;;  %v790_v45 = vadd.f32 %v1387_v6, %v742_v36 }
 0x1a0   : > { %v1043_v23 = vpop.eup %1042  ;;  %v605_v25 = vpop.xlane.xlu1 %604  ;;  %v675_v6 = vsub.f32 %v1352_v40, %v1409_v54  ;;  %v676_v62 = vsub.f32 %v1359_v50, %v1414_v18 }
 0x1a1   : > { %v634_v27 = vpop.xlane.xlu0 %633  ;;  %v695_v28 = vmul.f32 %v1043_v23, %v671_v21  ;;  %v683_v29 = vadd.f32 1e-05, %v667_v22  ;;  %v1417_v31 = vmul.f32 0.0625, %v605_v25  ;;  %vm798_vm2 = vcmp.gt.f32.partialorder %v790_v45, 0.0 }
 0x1a2   : > { %v652_v33 = vmul.f32 0.0625, %v634_v27 }
 0x1a3   : > { %v743_v19 = vmul.f32 %v1383_v4, %v695_v28  ;;  %1050 = vrsqrt.f32 %v683_v29  ;;  %v661_v38 = vmul.f32 %v1417_v31, %v1417_v31  ;;  %v303_v28 = vld [vmem:[%s1488_s4 + $0x28] sm:$0xff] }
 0x1a4   : > { %v1045_v0 = vpop.eup %1044  ;;  %v668_v26 = vsub.f32 %v652_v33, %v660_v34  ;;  %v637_v35 = vpop.xlane.xlu1 %636 }
 0x1a5   : > { %v696_v37 = vmul.f32 %v1045_v0, %v672_v55  ;;  %v653_v41 = vmul.f32 0.0625, %v637_v35  ;;  %v791_v43 = vadd.f32 %v1389_v7, %v743_v19 }
 0x1a6   : > { %v684_v42 = vadd.f32 1e-05, %v668_v26 }
 0x1a7   : > { %v744_v10 = vmul.f32 %v1385_v5, %v696_v37  ;;  %v669_v32 = vsub.f32 %v653_v41, %v661_v38  ;;  %v807_v51 = vmul.f32 0.2, %v791_v43  ;;  %vm799_vm1 = vcmp.gt.f32.partialorder %v791_v43, 0.0 }
 0x1a8   : > { %v1047_v4 = vpop.eup %1046  ;;  %1052 = vrsqrt.f32 %v684_v42  ;;  %v806_v5 = vmul.f32 0.2, %v790_v45  ;;  %v740_v50 = vpop.permute.xlu0 %739  ;;  %v304_v42 = vld [vmem:[%s1488_s4 + $0x30] sm:$0xff] }
 0x1a9   : > { %v697_v46 = vmul.f32 %v1047_v4, %v673_v44  ;;  %v685_v47 = vadd.f32 1e-05, %v669_v32  ;;  %v792_v12 = vadd.f32 %v1393_v9, %v744_v10  ;;  %v815_v56 = vsel %vm799_vm1, %v791_v43, %v807_v51  ;;  %v783_v0 = vpop.permute.xlu1 %782 }
 0x1aa   : > { %v814_v40 = vsel %vm798_vm2, %v790_v45, %v806_v5 }
 0x1ab   : > { %v745_v49 = vmul.f32 %v1391_v8, %v697_v46  ;;  %1054 = vrsqrt.f32 %v685_v47  ;;  %v808_v39 = vmul.f32 0.2, %v792_v12  ;;  %vm800_vm3 = vcmp.gt.f32.partialorder %v792_v12, 0.0  ;;  %v299_v8 = vld [vmem:[%s1488_s4 + $0x8] sm:$0xff] }
 0x1ac   : > { %v1049_v7 = vpop.eup %1048  ;;  %v823_v61 = vmul.f32 %v815_v56, %v299_v8  ;;  %v788_v43 = vpop.permute.xlu0 %787 }
 0x1ad   : > { %v793_v20 = vadd.f32 %v1399_v13, %v745_v49  ;;  %v698_v53 = vmul.f32 %v1049_v7, %v674_v52  ;;  %v298_v13 = vld [vmem:[%s1488_s4] sm:$0xff]  ;;  %v816_v54 = vsel %vm800_vm3, %v792_v12, %v808_v39  ;;  %v305_v12 = vld [vmem:[%s1488_s4 + $0x38] sm:$0xff] }
 0x1ae   : > { %v822_v3 = vmul.f32 %v814_v40, %v298_v13  ;;  %v824_v21 = vmul.f32 %v816_v54, %v300_v58  ;;  %v831_v27 = vsel %vm581_vm0, %v823_v61, 0.0  ;;  %v306_v13 = vld [vmem:[#allocation2] sm:$0x1] }
 0x1af   : > { %v809_v9 = vmul.f32 0.2, %v793_v20  ;;  %v746_v30 = vmul.f32 %v1395_v11, %v698_v53  ;;  %vm801_vm4 = vcmp.gt.f32.partialorder %v793_v20, 0.0  ;;  %v301_v11 = vld [vmem:[%s1488_s4 + $0x18] sm:$0xff] }
 0x1b0   : > { %v1051_v57 = vpop.eup %1050  ;;  %v833_v19 = vsel %vm581_vm0, %v824_v21, 0.0 }
 0x1b1   : > { %v699_v48 = vmul.f32 %v1051_v57, %v675_v6  ;;  %v794_v60 = vadd.f32 %v1403_v15, %v746_v30  ;;  %v817_v1 = vsel %vm801_vm4, %v793_v20, %v809_v9  ;;  %v302_v15 = vld [vmem:[%s1488_s4 + $0x20] sm:$0xff] }
 0x1b2   : > { %v825_v25 = vmul.f32 %v817_v1, %v301_v11 }
 0x1b3   : > { %v747_v63 = vmul.f32 %v1401_v14, %v699_v48  ;;  %vm802_vm5 = vcmp.gt.f32.partialorder %v794_v60, 0.0  ;;  %v810_v2 = vmul.f32 0.2, %v794_v60  ;;  %v677_v14 = vsub.f32 %v1366_v59, %v1417_v31 }
 0x1b4   : > { %v835_v31 = vsel %vm581_vm0, %v825_v25, 0.0 }
 0x1b5   : > { %v1053_v22 = vpop.eup %1052  ;;  %v795_v23 = vadd.f32 %v1407_v17, %v747_v63  ;;  %v818_v18 = vsel %vm802_vm5, %v794_v60, %v810_v2  ;;  %v830_v17 = vsel %vm581_vm0, %v822_v3, 0.0 }
 0x1b6   : > { %v700_v24 = vmul.f32 %v1053_v22, %v676_v62  ;;  %v826_v55 = vmul.f32 %v818_v18, %v302_v15  ;;  %v832_v36 = vadd.f32 %v831_v27, %v830_v17 }
 0x1b7   : > { %vm803_vm6 = vcmp.gt.f32.partialorder %v795_v23, 0.0  ;;  %v811_v29 = vmul.f32 0.2, %v795_v23 }
 0x1b8   : > { %v1055_v33 = vpop.eup %1054  ;;  %v748_v34 = vmul.f32 %v1405_v16, %v700_v24  ;;  %v834_v41 = vadd.f32 %v833_v19, %v832_v36  ;;  %v837_v44 = vsel %vm581_vm0, %v826_v55, 0.0 }
 0x1b9   : > { %v701_v26 = vmul.f32 %v1055_v33, %v677_v14  ;;  %v819_v35 = vsel %vm803_vm6, %v795_v23, %v811_v29 }
 0x1ba   : > { %v796_v37 = vadd.f32 %v783_v0, %v748_v34  ;;  %v827_v59 = vmul.f32 %v819_v35, %v303_v28  ;;  %v836_v32 = vadd.f32 %v835_v31, %v834_v41 }
 0x1bb   : > { %v749_v38 = vmul.f32 %v740_v50, %v701_v26 }
 0x1bc   : > { %vm804_vm7 = vcmp.gt.f32.partialorder %v796_v37, 0.0  ;;  %v812_v16 = vmul.f32 0.2, %v796_v37  ;;  %v839_v45 = vsel %vm581_vm0, %v827_v59, 0.0  ;;  %v838_v49 = vadd.f32 %v837_v44, %v836_v32 }
 0x1bd   : > { %v797_v10 = vadd.f32 %v788_v43, %v749_v38 }
 0x1be   : > { %v820_v4 = vsel %vm804_vm7, %v796_v37, %v812_v16  ;;  %v840_v52 = vadd.f32 %v839_v45, %v838_v49 }
 0x1bf   : > { %v828_v46 = vmul.f32 %v820_v4, %v304_v42  ;;  %vm805_vm8 = vcmp.gt.f32.partialorder %v797_v10, 0.0  ;;  %v813_v47 = vmul.f32 0.2, %v797_v10 }
 0x1c1   : > { %v821_v51 = vsel %vm805_vm8, %v797_v10, %v813_v47  ;;  %v841_v7 = vsel %vm581_vm0, %v828_v46, 0.0 }
 0x1c2   : > { %v829_v20 = vmul.f32 %v821_v51, %v305_v12  ;;  %v842_v5 = vadd.f32 %v841_v7, %v840_v52 }
 0x1c4   : > { %v843_v39 = vsel %vm581_vm0, %v829_v20, 0.0 }
 0x1c5   : > { %v844_v53 = vadd.f32 %v843_v39, %v842_v5 }
 0x1c7   : > { %845 = vadd.xlane.f32.xlu1 %v844_v53 }
 0x250   : > { %v846_v6 = vpop.xlane.xlu1 %845 }
 0x251   : > { %v847_v8 = vrot.slane %v846_v6, 4 }
 0x253   : > { %v848_v9 = vadd.f32 %v847_v8, %v846_v6 }
 0x255   : > { %v849_v56 = vrot.slane %v848_v9, 2 }
 0x257   : > { %v850_v57 = vadd.f32 %v849_v56, %v848_v9 }
 0x259   : > { %v851_v30 = vrot.slane %v850_v57, 1 }
 0x25b   : > { %v852_v48 = vadd.f32 %v851_v30, %v850_v57 }
 0x25d   : > { %1027 = vpush %v852_v48 }
 0x28e   : > { %s1028_s26 = spop %1027 }
 0x28f   : > { %v854_v58 = vstv %s1028_s26 }
 0x290   : > { %v855_v40 = vadd.f32 %v854_v58, %v306_v13 }
 0x292   : > { %857 = vst.msk [vmem:[%s249_s28] sm:$0x1] %vm856_vm9, %v855_v40 }
 0x293 PF: > { %s18_s23 = sadd.s32 1, %s1062_s23  }
 0x294   : > { %p15_p4 = scmp.ge.s32.totalorder %s18_s23, 4  }
 0x296   :  { %17 = sbr.rel (!%p15_p4) target bundleno = 3 (0x3), region = 74 }

</bundles_post_ra>
